<compile_context>
chip_gen: v7x
topology: tpu7x:2x2x1
jax: 0.10.0
libtpu: 0.0.40
codegen_flags: <defaults>
</compile_context>

<pallas_src>
import functools

import jax
import jax.numpy as jnp
from jax.experimental import pallas as pl
from jax.experimental.pallas import tpu as pltpu


def _linear_kernel(x_ref, w_ref, b_ref, o_ref, *, activation):
    """One grid step of a K-tiled matmul; output block doubles as accumulator."""
    k = pl.program_id(1)

    @pl.when(k == 0)
    def _():
        # Fold the bias add into the accumulator init.
        o_ref[...] = jnp.broadcast_to(b_ref[...], o_ref.shape)

    o_ref[...] += jnp.dot(
        x_ref[...], w_ref[...], preferred_element_type=jnp.float32
    )

    @pl.when(k == pl.num_programs(1) - 1)
    def _():
        if activation == "relu":
            o_ref[...] = jnp.maximum(o_ref[...], 0.0)
        elif activation == "clamp01":
            o_ref[...] = jnp.clip(o_ref[...], 0.0, 1.0)
        # "none": leave the accumulated value as-is.


def pallas_linear(x, w, b, *, activation="none", tk=None, n_blocks=1):
    """y = activation(x @ w + b).

    x: (B, K), w: (K, N), b: (1, N) -> y: (B, N), all float32.
    tk: K-tile size (defaults to whole K -> single reduction step).
    n_blocks: how many blocks to split N into (engages both TCs on v7x).
    """
    B, K = x.shape
    Kw, N = w.shape
    assert K == Kw
    if tk is None:
        tk = K
    assert K % tk == 0, (K, tk)
    assert N % n_blocks == 0, (N, n_blocks)
    tn = N // n_blocks

    kernel = functools.partial(_linear_kernel, activation=activation)
    return pl.pallas_call(
        kernel,
        out_shape=jax.ShapeDtypeStruct((B, N), jnp.float32),
        grid_spec=pltpu.PrefetchScalarGridSpec(
            num_scalar_prefetch=0,
            grid=(n_blocks, K // tk),
            in_specs=[
                pl.BlockSpec((B, tk), lambda j, k: (0, k)),   # activations
                pl.BlockSpec((tk, tn), lambda j, k: (k, j)),  # weights
                pl.BlockSpec((1, tn), lambda j, k: (0, j)),   # bias
            ],
            out_specs=pl.BlockSpec((B, tn), lambda j, k: (0, j)),
        ),
        compiler_params=pltpu.CompilerParams(
            dimension_semantics=("parallel", "arbitrary"),
        ),
    )(x, w, b)


def init_linear_params(key, in_features, out_features):
    """Deterministic init mimicking nn.Linear (uniform +/- 1/sqrt(in))."""
    kw, kb = jax.random.split(key)
    bound = 1.0 / (in_features ** 0.5)
    # Stored as (in, out) == PyTorch weight.T so the kernel does x @ w.
    w = jax.random.uniform(
        kw, (in_features, out_features), jnp.float32, -bound, bound
    )
    b = jax.random.uniform(
        kb, (1, out_features), jnp.float32, -bound, bound
    )
    return w, b


def simple_net_forward(x_nchw, params):
    # Glue: torch.flatten(x, 1) -> (B, 768)
    x = x_nchw.reshape(x_nchw.shape[0], -1)
    (w1, b1), (w2, b2), (w3, b3), (w4, b4) = params
    # Layer 1: whole-K (768) single reduction step, N split across cores.
    x = pallas_linear(x, w1, b1, activation="relu", tk=768, n_blocks=2)
    # Layers 2/3: K=2048 in two 1024 slabs, N split across cores.
    x = pallas_linear(x, w2, b2, activation="relu", tk=1024, n_blocks=2)
    x = pallas_linear(x, w3, b3, activation="relu", tk=1024, n_blocks=2)
    # Layer 4: 2048 -> 1; weight is 8 KB, run it as a single grid step.
    x = pallas_linear(x, w4, b4, activation="clamp01", tk=2048, n_blocks=1)
    return x


if __name__ == "__main__":
    key = jax.random.PRNGKey(0)
    k_in, k1, k2, k3, k4 = jax.random.split(key, 5)

    # (B, C, H, W) with C*H*W = 768, matching torch.flatten(x, 1) -> 768 feats.
    x = jax.random.normal(k_in, (8, 3, 16, 16), jnp.float32)

    params = [
        init_linear_params(k1, 768, 2048),
        init_linear_params(k2, 2048, 2048),
        init_linear_params(k3, 2048, 2048),
        init_linear_params(k4, 2048, 1),
    ]

    out = simple_net_forward(x, params)
    out = jax.block_until_ready(out)

    # Reference check in plain JAX.
    xr = x.reshape(x.shape[0], -1)
    for i, (w, b) in enumerate(params):
        xr = xr @ w + b
        xr = jnp.maximum(xr, 0.0) if i < 3 else jnp.clip(xr, 0.0, 1.0)
    assert out.shape == (8, 1)
    assert jnp.allclose(out, xr, atol=1e-4, rtol=1e-4)

    print("KERNEL_OK")
</pallas_src>

<mosaic_0001>
module attributes {stable_mosaic.version = 11 : i64} {
  func.func @_linear_kernel(%arg0: i32, %arg1: i32, %arg2: memref<8x768xf32, #tpu.memory_space<vmem>>, %arg3: memref<768x1024xf32, #tpu.memory_space<vmem>>, %arg4: memref<1x1024xf32, #tpu.memory_space<vmem>>, %arg5: memref<8x1024xf32, #tpu.memory_space<vmem>>) attributes {dimension_semantics = [#tpu.dimension_semantics<parallel>, #tpu.dimension_semantics<arbitrary>], iteration_bounds = array<i64: 2, 1>, scalar_prefetch = 0 : i64, scratch_operands = 0 : i64, tpu.core_type = #tpu.core_type<tc>, window_params = [{transform_indices = @transform_0, window_bounds = array<i64: 8, 768>}, {transform_indices = @transform_1, window_bounds = array<i64: 768, 1024>}, {transform_indices = @transform_2, window_bounds = array<i64: 1, 1024>}, {transform_indices = @transform_3, window_bounds = array<i64: 8, 1024>}]} {
    %c0_i32 = arith.constant 0 : i32
    %0 = arith.cmpi eq, %arg1, %c0_i32 : i32
    %1 = arith.extui %0 : i1 to i32
    %c0_i32_0 = arith.constant 0 : i32
    %2 = arith.cmpi ne, %1, %c0_i32_0 : i32
    scf.if %2 {
      %c0_10 = arith.constant 0 : index
      %c0_11 = arith.constant 0 : index
      %12 = vector.load %arg4[%c0_10, %c0_11] : memref<1x1024xf32, #tpu.memory_space<vmem>>, vector<1x1024xf32>
      %13 = vector.shape_cast %12 : vector<1x1024xf32> to vector<1x1024xf32>
      %14 = vector.broadcast %13 : vector<1x1024xf32> to vector<8x1024xf32>
      %c0_12 = arith.constant 0 : index
      %c0_13 = arith.constant 0 : index
      %15 = vector.load %arg5[%c0_12, %c0_13] : memref<8x1024xf32, #tpu.memory_space<vmem>>, vector<8x1024xf32>
      tpu.vector_store %arg5[%c0_12, %c0_13], %14 {strides = array<i32>} : memref<8x1024xf32, #tpu.memory_space<vmem>>, vector<8x1024xf32>,
    } else {
    }
    %c0 = arith.constant 0 : index
    %c0_1 = arith.constant 0 : index
    %3 = vector.load %arg5[%c0, %c0_1] : memref<8x1024xf32, #tpu.memory_space<vmem>>, vector<8x1024xf32>
    %c0_2 = arith.constant 0 : index
    %c0_3 = arith.constant 0 : index
    %4 = vector.load %arg2[%c0_2, %c0_3] : memref<8x768xf32, #tpu.memory_space<vmem>>, vector<8x768xf32>
    %c0_4 = arith.constant 0 : index
    %c0_5 = arith.constant 0 : index
    %5 = vector.load %arg3[%c0_4, %c0_5] : memref<768x1024xf32, #tpu.memory_space<vmem>>, vector<768x1024xf32>
    %cst = arith.constant dense<0.000000e+00> : vector<8x1024xf32>
    %6 = tpu.matmul %4, %5, %cst {dimension_numbers = #tpu.dot_dimension_numbers<[1], [0], [0], [1], [0, 0, 1, 1], [], []>} : vector<8x768xf32>, vector<768x1024xf32>, vector<8x1024xf32> -> vector<8x1024xf32>
    %7 = arith.addf %3, %6 : vector<8x1024xf32>
    %c0_6 = arith.constant 0 : index
    %c0_7 = arith.constant 0 : index
    %8 = vector.load %arg5[%c0_6, %c0_7] : memref<8x1024xf32, #tpu.memory_space<vmem>>, vector<8x1024xf32>
    tpu.vector_store %arg5[%c0_6, %c0_7], %7 {strides = array<i32>} : memref<8x1024xf32, #tpu.memory_space<vmem>>, vector<8x1024xf32>,
    %c0_i32_8 = arith.constant 0 : i32
    %9 = arith.cmpi eq, %arg1, %c0_i32_8 : i32
    %10 = arith.extui %9 : i1 to i32
    %c0_i32_9 = arith.constant 0 : i32
    %11 = arith.cmpi ne, %10, %c0_i32_9 : i32
    scf.if %11 {
      %c0_10 = arith.constant 0 : index
      %c0_11 = arith.constant 0 : index
      %12 = vector.load %arg5[%c0_10, %c0_11] : memref<8x1024xf32, #tpu.memory_space<vmem>>, vector<8x1024xf32>
      %cst_12 = arith.constant 0.000000e+00 : f32
      %13 = vector.broadcast %cst_12 : f32 to vector<8x1024xf32>
      %14 = arith.maximumf %12, %13 : vector<8x1024xf32>
      %c0_13 = arith.constant 0 : index
      %c0_14 = arith.constant 0 : index
      %15 = vector.load %arg5[%c0_13, %c0_14] : memref<8x1024xf32, #tpu.memory_space<vmem>>, vector<8x1024xf32>
      tpu.vector_store %arg5[%c0_13, %c0_14], %14 {strides = array<i32>} : memref<8x1024xf32, #tpu.memory_space<vmem>>, vector<8x1024xf32>,
    } else {
    }
    return
  }
  func.func @transform_0(%arg0: i32, %arg1: i32) -> (i32, i32) {
    %c0_i32 = arith.constant 0 : i32
    %c0_i32_0 = arith.constant 0 : i32
    return %c0_i32, %arg1 : i32, i32
  }
  func.func @transform_1(%arg0: i32, %arg1: i32) -> (i32, i32) {
    %c0_i32 = arith.constant 0 : i32
    return %arg1, %arg0 : i32, i32
  }
  func.func @transform_2(%arg0: i32, %arg1: i32) -> (i32, i32) {
    %c0_i32 = arith.constant 0 : i32
    %c0_i32_0 = arith.constant 0 : i32
    return %c0_i32, %arg0 : i32, i32
  }
  func.func @transform_3(%arg0: i32, %arg1: i32) -> (i32, i32) {
    %c0_i32 = arith.constant 0 : i32
    %c0_i32_0 = arith.constant 0 : i32
    return %c0_i32, %arg0 : i32, i32
  }
}

</mosaic_0001>

<bundles_post_ra>
// kernel: tpu_custom_call.1
= control target key start
LH: loop header
LB: loop body
LE: loop exit
PB: predicated region body
PF: predicated region fallthrough
CT: control target
= control target key end

     0   :  { %s4258_s0 = inlined_call_operand.hbm [shape: f32[8,768], index: 0, kind: input, shape index: {}]   ;;  %s4259_s1 = inlined_call_operand.hbm [shape: f32[768,2048], index: 1, kind: input, shape index: {}]   ;;  %s4260_s2 = inlined_call_operand.hbm [shape: f32[1,2048], index: 2, kind: input, shape index: {}]   ;;  %s4261_s3 = inlined_call_operand.hbm [shape: f32[8,2048], index: 3, kind: output, shape index: {}]  }
   0x1   :  { %4267 = sst [smem:[#allocation12_spill]] %s4259_s1 }
   0x2   :  { %8 = vsyncpa [#allocation3], 0 }
   0x3   :  { %9 = vsyncpa [#allocation6], 0 }
   0x4   :  { %11 = vsyncpa [#allocation6 + $0x1], 0 }
   0x5   :  { %12 = vsyncpa [#allocation4], 0 }
   0x6   :  { %14 = vsyncpa [#allocation4 + $0x1], 0  ;;  %s3226_s12 = smov 0   ;;  %s3228_s13 = smov 0  }
   0x7   :  { %s3230_s14 = smov 0   ;;  %s3232_s15 = smov 0  }
   0x8   :  { %s3234_s16 = smov 0   ;;  %s3236_s17 = smov 0  }
   0x9 LB: > { %s32_s18 = sadd.s32 1, %s3193_s16  ;;  %s67_s19 = sadd.s32 1, %s3185_s14  ;;  %s3197_s17 = sphi %s3236_s17, %s20_s17   ;;  %s3193_s16 = sphi %s3234_s16, %s4287_s16   ;;  %s3189_s15 = sphi %s3232_s15, %s4286_s15   ;;  %s3185_s14 = sphi %s3230_s14, %s4285_s14   ;;  %s3181_s13 = sphi %s3228_s13, %s4284_s13   ;;  %s3177_s12 = sphi %s3226_s12, %s4283_s12  }
   0xa   : > { %p34_p0 = scmp.ge.s32.totalorder %s32_s18, 2  ;;  %p74_p1 = scmp.ne.s32.totalorder %s3185_s14, %s3181_s13 }
   0xb   : > { %p75_p2 = scmp.eq.s32.totalorder %s3197_s17, 0  ;;  %p2962_p5 = scmp.lt.s32.totalorder %s3197_s17, 2 }
   0xc   : > { %s4289_s18 = smov (%p34_p0, %s32_s18), 0  ;;  %s170_s21 = sand.u32 1, %s3197_s17  }
   0xd   : > { %p76_p4 = por %p75_p2, %p74_p1  ;;  %s63_s20 = ssub.s32 %s3193_s16, %s4289_s18 }
   0xe   : > { %p65_p6 = scmp.eq.s32.totalorder %s63_s20, 0  ;;  %s172_s22 = sand.u32 1, %s3185_s14  }
   0xf   : > { %s2147_s23 = sshll.u32 %s3193_s16, 10  ;;  %s2934_s25 = smul.u32 6144, %s172_s22 }
  0x10   : > { %s3274_s24 = scalar_select %p65_p6, %s3185_s14, %s67_s19  }
  0x11   : > { %s4268_s1 = sld [smem:[#allocation12_spill]]  ;;  %p3283_p7 = pnand %p2962_p5, %p76_p4 }
  0x12   : > { %s174_s30 = scalar_lea.vmem [#allocation5], %s2934_s25  ;;  %s3289_s5 = scalar_lea.sflag [#allocation6], %s170_s21 }
  0x13   : > { %s184_s4 = sshll.u32 %s174_s30, 4  ;;  %p3025_p9 = pneg %p3283_p7  ;;  %s3287_s4 = int_to_ptr.vmem [resolvable:$true] %s184_s4 }
  0x17   : > { %s3281_s28 = scalar_lea.hbm %s4268_s1, %s2147_s23  ;;  %s3028_s9 = scalar_lea.hbm %s4268_s1, 196608 }
  0x18   : > { %s3023_s6 = scalar_lea.hbm %s3281_s28, 98304  ;;  %p3029_p12 = scmp.lt.u32.totalorder %s3281_s28, %s4268_s1 }
  0x19   : > { %p3024_p8 = scmp.ne.s32.totalorder %s3281_s28, %s3023_s6  ;;  %p3030_p13 = scmp.lt.u32.totalorder %s3028_s9, %s3023_s6 }
  0x1a   : > { %p3032_p2 = scmp.lt.u32.totalorder %s3023_s6, %s3281_s28 }
  0x1b   : > { %p3026_p10 = pnand %p3025_p9, %p3024_p8  ;;  %p3031_p0 = por %p3030_p13, %p3029_p12 }
  0x1d   : > { %p3027_p11 = pneg %p3026_p10  ;;  %p3033_p4 = por %p3032_p2, %p3031_p0 }
  0x1f   : > { %p3034_p5 = pnand %p3033_p4, %p3027_p11 }
  0x21   : > { %3037 = shalt.err (!%p3034_p5)
}
  0x22   : > { %s3038_s19 = scalar_lea.vmem %s3287_s4, 98304  ;;  %s3199_s20 = smov [#allocation5]  }
  0x23   : > { %p3039_p6 = scmp.ne.s32.totalorder %s3287_s4, %s3038_s19  ;;  %s3043_s21 = sshll.u32 %s3199_s20, 4  ;;  %s3044_s21 = int_to_ptr.vmem [resolvable:$false] %s3043_s21 }
  0x24   : > { %s3045_s23 = scalar_lea.vmem %s3044_s21, 196608  ;;  %p3046_p3 = scmp.lt.s32.totalorder %s3287_s4, %s3044_s21 }
  0x25   : > { %p3041_p8 = pnand %p3039_p6, %p3025_p9  ;;  %p3047_p12 = scmp.lt.s32.totalorder %s3045_s23, %s3038_s19 }
  0x27   : > { %p3042_p10 = pneg %p3041_p8  ;;  %p3048_p13 = por %p3047_p12, %p3046_p3 }
  0x29   : > { %p3049_p0 = pnand %p3048_p13, %p3042_p10 }
  0x2b   : > { %3052 = shalt.err (!%p3049_p0)
}
  0x2c   : > { %s3200_s25 = smov 2048   ;;  %s3201_s26 = smov 1024  }
  0x2d   : > { %s3202_s27 = smov 64   ;;  %s3318_s30 = sadd.s32 4294967295, %s3197_s17  }
  0x2e   : > { %2953 = dma.hbm_to_vmem [thread:$0]  (!%p3283_p7), %s3281_s28, 98304, %s3287_s4, %s3289_s5, %s3200_s25, %s3201_s26, %s3202_s27  }
  0x2f   : > { %s2129_s6 = sadd.s32 4294967294, %s3197_s17   ;;  %p80_p3 = scmp.ne.s32.totalorder %s3181_s13, %s3177_s12 }
  0x30   : > { %p4262_p11 = scmp.eq.s32.totalorder %s3318_s30, 0  ;;  %p130_p2 = scmp.eq.s32.totalorder %s3318_s30, 1 }
  0x31   : > { %p136_p4 = scmp.eq.s32.totalorder %s2129_s6, 1  ;;  %p2130_p6 = scmp.ge.s32.totalorder %s3197_s17, 1 }
  0x32   : > { %p3327_p5 = por %p4262_p11, %p80_p3  ;;  %p3335_p8 = por %p130_p2, %p74_p1 }
  0x33   : > { %p3339_p10 = por %p136_p4, %p80_p3  ;;  %p143_p12 = scmp.lt.s32.totalorder %s3197_s17, 3 }
  0x34   : > { %s4270_s7 = scalar_select %p3327_p5, 1, 0 }
  0x35   : > { %s4271_s28 = scalar_select %p3335_p8, 1, 0 }
  0x36   : > { %s4272_s4 = scalar_select %p3339_p10, 1, 0 }
  0x37   : > { %s2135_s8 = sshll.u32 %s172_s22, 3  ;;  %p3346_p13 = pnand %p2130_p6, %p143_p12 }
  0x38   : > { %s3203_s10 = smov [#allocation2]   ;;  %s2148_s19 = sshll.u32 %s3193_s16, 7 }
  0x39   : > { %s4273_s9 = scalar_select %p3346_p13, 1, 0 }
  0x3a   : > { %s159_s11 = sshll.u32 %s3203_s10, 4  ;;  %p2946_p1 = pneg %p3346_p13  ;;  %s3350_s11 = int_to_ptr.vmem [resolvable:$true] %s159_s11 }
  0x3b   : > { %s3358_s23 = scalar_lea.hbm %s4260_s2, %s2148_s19  ;;  %s198_s22 = scalar_lea.vmem [#allocation7], %s2135_s8 }
  0x3c   : > { %s206_s25 = sshll.u32 %s198_s22, 4  ;;  %p3362_p0 = pnand %p2946_p1, %p4262_p11  ;;  %s207_s25 = int_to_ptr.vmem [resolvable:$true] %s206_s25 }
  0x3d   : > { %s3053_s27 = scalar_lea.hbm %s3358_s23, 128  ;;  %s3058_s19 = scalar_lea.hbm %s4260_s2, 256 }
  0x3e   : > { %s4274_s26 = scalar_select %p3362_p0, 1, 0 }
  0x3f   : > { %p3054_p3 = scmp.ne.s32.totalorder %s3358_s23, %s3053_s27  ;;  %p3059_p6 = scmp.lt.u32.totalorder %s3358_s23, %s4260_s2 }
  0x40   : > { %p3060_p12 = scmp.lt.u32.totalorder %s3058_s19, %s3053_s27  ;;  %p3062_p11 = scmp.lt.u32.totalorder %s3053_s27, %s3358_s23 }
  0x41   : > { %p3056_p2 = pnand %p3054_p3, %p3025_p9 }
  0x42   : > { %p3061_p1 = por %p3060_p12, %p3059_p6 }
  0x43   : > { %p3057_p4 = pneg %p3056_p2 }
  0x44   : > { %p3063_p10 = por %p3062_p11, %p3061_p1 }
  0x46   : > { %p3064_p8 = pnand %p3063_p10, %p3057_p4 }
  0x48   : > { %3067 = shalt.err (!%p3064_p8)
}
  0x49   : > { %s3068_s8 = scalar_lea.vmem %s207_s25, 128  ;;  %s3204_s22 = smov [#allocation7]  }
  0x4a   : > { %p3069_p5 = scmp.ne.s32.totalorder %s207_s25, %s3068_s8  ;;  %s3073_s6 = sshll.u32 %s3204_s22, 4  ;;  %s3074_s6 = int_to_ptr.vmem [resolvable:$false] %s3073_s6 }
  0x4b   : > { %s3075_s10 = scalar_lea.vmem %s3074_s6, 256  ;;  %p3076_p13 = scmp.lt.s32.totalorder %s207_s25, %s3074_s6 }
  0x4c   : > { %p3071_p3 = pnand %p3069_p5, %p3025_p9  ;;  %p3077_p0 = scmp.lt.s32.totalorder %s3075_s10, %s3068_s8 }
  0x4e   : > { %p3072_p2 = pneg %p3071_p3  ;;  %p3078_p6 = por %p3077_p0, %p3076_p13 }
  0x50   : > { %p3079_p12 = pnand %p3078_p6, %p3072_p2 }
  0x52   : > { %3082 = shalt.err (!%p3079_p12)
}
  0x53   : > { %2956 = dma.hbm_to_vmem [thread:$0]  (!%p3283_p7), %s3358_s23, 128, %s207_s25, %s3289_s5  }
  0x54   : > { %s3083_s20 = scalar_lea.hbm %s4258_s0, 768  ;;  %p4275_p11 = scmp.ne.s32.totalorder %s4274_s26, 0 }
  0x55   : > { %p3084_p9 = scmp.ne.s32.totalorder %s4258_s0, %s3083_s20  ;;  %p3090_p13 = scmp.lt.u32.totalorder %s3083_s20, %s4258_s0 }
  0x56   : > { %p3085_p5 = pneg %p4275_p11 }
  0x58   : > { %p3086_p8 = pnand %p3085_p5, %p3084_p9 }
  0x5a   : > { %p3087_p10 = pneg %p3086_p8 }
  0x5c   : > { %p3092_p0 = pnand %p3090_p13, %p3087_p10 }
  0x5e   : > { %3095 = shalt.err (!%p3092_p0)
}
  0x5f   : > { %s3096_s29 = scalar_lea.vmem %s3350_s11, 768  ;;  %p3104_p3 = scmp.lt.s32.totalorder %s3350_s11, %s3350_s11 }
  0x60   : > { %p3097_p7 = scmp.ne.s32.totalorder %s3350_s11, %s3096_s29  ;;  %p3105_p2 = scmp.lt.s32.totalorder %s3096_s29, %s3096_s29 }
  0x62   : > { %p3099_p4 = pnand %p3097_p7, %p3085_p5  ;;  %p3106_p6 = por %p3105_p2, %p3104_p3 }
  0x64   : > { %p3100_p1 = pneg %p3099_p4 }
  0x66   : > { %p3107_p12 = pnand %p3106_p6, %p3100_p1 }
  0x68   : > { %3110 = shalt.err (!%p3107_p12)
}
  0x69   : > { %2949 = dma.hbm_to_vmem [thread:$0]  (!%p4275_p11), %s4258_s0, 768, %s3350_s11, [#allocation3]  }
  0x6a   : > { %p4276_p9 = scmp.ne.s32.totalorder %s4273_s9, 0 }
  0x6b   : > { %p4277_p8 = scmp.eq.s32.totalorder (!%p4276_p9), %s3318_s30, 0 }
  0x6c   : > { %215 = sbr.rel (%p4276_p9) target bundleno = 741 (0x2e5), region = 32 }
  0x73   : > { %3164 = dma.done.wait (%p4277_p8), [#allocation3], 768   ;;  %p4278_p5 = pmov %p4277_p8 }
  0x74   : > { %s221_s23 = sand.u32 1, %s3318_s30   ;;  %s3415_s25 = sand.u32 1, %s3181_s13  }
  0x75   : > { %3166 = vsyncadd (%p4278_p5), [#allocation3], 4294966528  ;;  %s2935_s26 = smul.u32 6144, %s3415_s25  ;;  %s222_s6 = scalar_lea.sflag [#allocation6], %s221_s23 }
  0x76   : > { %p4279_p11 = scmp.ne.s32.totalorder %s4270_s7, 0 }
  0x77   : > { %s3418_s10 = scalar_lea.vmem [#allocation5], %s2935_s26 }
  0x78   : > { %3168 = dma.done.wait (%p4279_p11), %s222_s6, 98432  }
  0x79   : > { %3170 = vsyncadd (%p4279_p11), %s222_s6, 4294868864  ;;  %v336_v0 = vld [vmem:[%s3418_s10 + $0x8] sm:$0xff]  ;;  %v338_v2 = vld [vmem:[%s3418_s10 + $0x18] sm:$0xff]  ;;  %s2140_s30 = sshll.u32 %s3415_s25, 3  ;;  %s2141_s9 = sshll.u32 %s3415_s25, 6 }
  0x7a   : > { %v344_v1 = vld [vmem:[%s3418_s10 + $0x48] sm:$0xff]  ;;  %v346_v4 = vld [vmem:[%s3418_s10 + $0x58] sm:$0xff]  ;;  %v335_v5 = vld [vmem:[%s3418_s10] sm:$0xff]  ;;  %s234_s7 = scalar_lea.vmem [#allocation7], %s2140_s30  ;;  %s4194_s11 = scalar_lea.vmem [#allocation8], %s2141_s9 }
  0x7b   : > { %v2150_v3 = vpack.c.bf16 %v344_v1, %v336_v0  ;;  %v343_v6 = vld [vmem:[%s3418_s10 + $0x40] sm:$0xff]  ;;  %v2342_v7 = vpack.c.bf16 %v346_v4, %v338_v2  ;;  %v337_v9 = vld [vmem:[%s3418_s10 + $0x10] sm:$0xff]  ;;  %v352_v11 = vld [vmem:[%s3418_s10 + $0x88] sm:$0xff]  ;;  %s2149_s27 = sshll.u32 %s3189_s15, 10  ;;  %s2013_s19 = sshll.u32 %s4194_s11, 4  ;;  %s4208_s19 = int_to_ptr.vmem [resolvable:$true] %s2013_s19 }
  0x7c   : > { %v2152_v8 = vpack.c.bf16 %v343_v6, %v335_v5  ;;  %v345_v10 = vld [vmem:[%s3418_s10 + $0x50] sm:$0xff]  ;;  %v360_v13 = vld [vmem:[%s3418_s10 + $0xc8] sm:$0xff]  ;;  %v354_v14 = vld [vmem:[%s3418_s10 + $0x98] sm:$0xff]  ;;  %s4206_s8 = scalar_lea.hbm %s4261_s3, %s2149_s27  ;;  %s1999_s15 = scalar_lea.sflag [#allocation4], %s3415_s25 }
  0x7d   : > { %2151 = vmatprep.subr.bf16.mxu0 %v2150_v3  ;;  %v2344_v12 = vpack.c.bf16 %v345_v10, %v337_v9  ;;  %v362_v15 = vld [vmem:[%s3418_s10 + $0xd8] sm:$0xff]  ;;  %2343 = vmatprep.subr.bf16.mxu1 %v2342_v7  ;;  %v2154_v16 = vpack.c.bf16 %v360_v13, %v352_v11  ;;  %v351_v18 = vld [vmem:[%s3418_s10 + $0x80] sm:$0xff]  ;;  %v353_v20 = vld [vmem:[%s3418_s10 + $0x90] sm:$0xff]  ;;  %s3111_s22 = scalar_lea.vmem %s4208_s19, 1024  ;;  %p4280_p13 = scmp.ne.s32.totalorder %s4271_s28, 0 }
  0x7e   : > { %2153 = vmatpush1.bf16.msra.mxu0 %v2152_v8  ;;  %v2346_v17 = vpack.c.bf16 %v362_v15, %v354_v14  ;;  %v359_v19 = vld [vmem:[%s3418_s10 + $0xc0] sm:$0xff]  ;;  %v361_v22 = vld [vmem:[%s3418_s10 + $0xd0] sm:$0xff]  ;;  %v368_v23 = vld [vmem:[%s3418_s10 + $0x108] sm:$0xff]  ;;  %p3112_p10 = scmp.ne.s32.totalorder %s4208_s19, %s3111_s22  ;;  %s3205_s29 = smov [#allocation8]  }
  0x7f   : > { %2345 = vmatpush1.bf16.msra.mxu1 %v2344_v12  ;;  %v2156_v21 = vpack.c.bf16 %v359_v19, %v351_v18  ;;  %v376_v24 = vld [vmem:[%s3418_s10 + $0x148] sm:$0xff]  ;;  %2155 = vmatprep.subr.bf16.mxu0 %v2154_v16  ;;  %v2348_v25 = vpack.c.bf16 %v361_v22, %v353_v20  ;;  %v370_v27 = vld [vmem:[%s3418_s10 + $0x118] sm:$0xff]  ;;  %v367_v29 = vld [vmem:[%s3418_s10 + $0x100] sm:$0xff]  ;;  %s3115_s1 = sshll.u32 %s3205_s29, 4  ;;  %s3116_s1 = int_to_ptr.vmem [resolvable:$false] %s3115_s1 }
  0x80   : > { %2347 = vmatprep.subr.bf16.mxu1 %v2346_v17  ;;  %v2158_v26 = vpack.c.bf16 %v376_v24, %v368_v23  ;;  %v378_v28 = vld [vmem:[%s3418_s10 + $0x158] sm:$0xff]  ;;  %v375_v31 = vld [vmem:[%s3418_s10 + $0x140] sm:$0xff]  ;;  %v369_v32 = vld [vmem:[%s3418_s10 + $0x110] sm:$0xff]  ;;  %p3113_p0 = pnand %p3112_p10, %p4280_p13  ;;  %s3117_s5 = scalar_lea.vmem %s3116_s1, 2048 }
  0x81   : > { %v2350_v30 = vpack.c.bf16 %v378_v28, %v370_v27  ;;  %v377_v33 = vld [vmem:[%s3418_s10 + $0x150] sm:$0xff]  ;;  %v2160_v34 = vpack.c.bf16 %v375_v31, %v367_v29  ;;  %v384_v35 = vld [vmem:[%s3418_s10 + $0x188] sm:$0xff]  ;;  %v386_v37 = vld [vmem:[%s3418_s10 + $0x198] sm:$0xff]  ;;  %p3118_p4 = scmp.lt.s32.totalorder %s4208_s19, %s3116_s1  ;;  %p3119_p1 = scmp.lt.s32.totalorder %s3117_s5, %s3111_s22 }
  0x82   : > { %2157 = vmatpush1.bf16.msra.mxu0 %v2156_v21  ;;  %v392_v36 = vld [vmem:[%s3418_s10 + $0x1c8] sm:$0xff]  ;;  %v2352_v38 = vpack.c.bf16 %v377_v33, %v369_v32  ;;  %v394_v40 = vld [vmem:[%s3418_s10 + $0x1d8] sm:$0xff]  ;;  %v383_v41 = vld [vmem:[%s3418_s10 + $0x180] sm:$0xff]  ;;  %p3114_p7 = pneg %p3113_p0 }
  0x83   : > { %2349 = vmatpush1.bf16.msra.mxu1 %v2348_v25  ;;  %2159 = vmatprep.subr.bf16.mxu0 %v2158_v26  ;;  %v2162_v39 = vpack.c.bf16 %v392_v36, %v384_v35  ;;  %v391_v42 = vld [vmem:[%s3418_s10 + $0x1c0] sm:$0xff]  ;;  %v2354_v43 = vpack.c.bf16 %v394_v40, %v386_v37  ;;  %v385_v44 = vld [vmem:[%s3418_s10 + $0x190] sm:$0xff]  ;;  %v400_v46 = vld [vmem:[%s3418_s10 + $0x208] sm:$0xff]  ;;  %p3120_p3 = por %p3119_p1, %p3118_p4 }
  0x84   : > { %2351 = vmatprep.subr.bf16.mxu1 %v2350_v30  ;;  %v393_v45 = vld [vmem:[%s3418_s10 + $0x1d0] sm:$0xff]  ;;  %v408_v47 = vld [vmem:[%s3418_s10 + $0x248] sm:$0xff]  ;;  %v402_v48 = vld [vmem:[%s3418_s10 + $0x218] sm:$0xff]  ;;  %v2164_v50 = vpack.c.bf16 %v391_v42, %v383_v41 }
  0x85   : > { %v410_v49 = vld [vmem:[%s3418_s10 + $0x258] sm:$0xff]  ;;  %v2356_v51 = vpack.c.bf16 %v393_v45, %v385_v44  ;;  %v2166_v52 = vpack.c.bf16 %v408_v47, %v400_v46  ;;  %v399_v53 = vld [vmem:[%s3418_s10 + $0x200] sm:$0xff]  ;;  %v401_v55 = vld [vmem:[%s3418_s10 + $0x210] sm:$0xff]  ;;  %p3121_p2 = pnand %p3120_p3, %p3114_p7 }
  0x86   : > { %2161 = vmatpush1.bf16.msra.mxu0 %v2160_v34  ;;  %v407_v54 = vld [vmem:[%s3418_s10 + $0x240] sm:$0xff]  ;;  %v2358_v56 = vpack.c.bf16 %v410_v49, %v402_v48  ;;  %v409_v57 = vld [vmem:[%s3418_s10 + $0x250] sm:$0xff]  ;;  %v416_v58 = vld [vmem:[%s3418_s10 + $0x288] sm:$0xff] }
  0x87   : > { %2353 = vmatpush1.bf16.msra.mxu1 %v2352_v38  ;;  %2163 = vmatprep.subr.bf16.mxu0 %v2162_v39  ;;  %v424_v59 = vld [vmem:[%s3418_s10 + $0x2c8] sm:$0xff]  ;;  %v418_v60 = vld [vmem:[%s3418_s10 + $0x298] sm:$0xff]  ;;  %v2168_v62 = vpack.c.bf16 %v407_v54, %v399_v53  ;;  %v2360_v63 = vpack.c.bf16 %v409_v57, %v401_v55  ;;  %v415_v1 = vld [vmem:[%s3418_s10 + $0x280] sm:$0xff] }
  0x88   : > { %2355 = vmatprep.subr.bf16.mxu1 %v2354_v43  ;;  %v426_v61 = vld [vmem:[%s3418_s10 + $0x2d8] sm:$0xff]  ;;  %v2170_v0 = vpack.c.bf16 %v424_v59, %v416_v58  ;;  %v423_v2 = vld [vmem:[%s3418_s10 + $0x2c0] sm:$0xff]  ;;  %v417_v3 = vld [vmem:[%s3418_s10 + $0x290] sm:$0xff] }
  0x89   : > { %v2362_v4 = vpack.c.bf16 %v426_v61, %v418_v60  ;;  %v425_v5 = vld [vmem:[%s3418_s10 + $0x2d0] sm:$0xff]  ;;  %v432_v6 = vld [vmem:[%s3418_s10 + $0x308] sm:$0xff]  ;;  %v434_v8 = vld [vmem:[%s3418_s10 + $0x318] sm:$0xff]  ;;  %v2172_v10 = vpack.c.bf16 %v423_v2, %v415_v1 }
  0x8a   : > { %2165 = vmatpush1.bf16.msra.mxu0 %v2164_v50  ;;  %v440_v7 = vld [vmem:[%s3418_s10 + $0x348] sm:$0xff]  ;;  %v442_v9 = vld [vmem:[%s3418_s10 + $0x358] sm:$0xff]  ;;  %v2364_v11 = vpack.c.bf16 %v425_v5, %v417_v3  ;;  %v431_v13 = vld [vmem:[%s3418_s10 + $0x300] sm:$0xff] }
  0x8b   : > { %2357 = vmatpush1.bf16.msra.mxu1 %v2356_v51  ;;  %2167 = vmatprep.subr.bf16.mxu0 %v2166_v52  ;;  %v2174_v12 = vpack.c.bf16 %v440_v7, %v432_v6  ;;  %v439_v14 = vld [vmem:[%s3418_s10 + $0x340] sm:$0xff]  ;;  %v433_v15 = vld [vmem:[%s3418_s10 + $0x310] sm:$0xff]  ;;  %v2366_v16 = vpack.c.bf16 %v442_v9, %v434_v8  ;;  %v448_v18 = vld [vmem:[%s3418_s10 + $0x388] sm:$0xff] }
  0x8c   : > { %2359 = vmatprep.subr.bf16.mxu1 %v2358_v56  ;;  %v441_v17 = vld [vmem:[%s3418_s10 + $0x350] sm:$0xff]  ;;  %v456_v19 = vld [vmem:[%s3418_s10 + $0x3c8] sm:$0xff]  ;;  %v450_v20 = vld [vmem:[%s3418_s10 + $0x398] sm:$0xff]  ;;  %v2176_v22 = vpack.c.bf16 %v439_v14, %v431_v13 }
  0x8d   : > { %v458_v21 = vld [vmem:[%s3418_s10 + $0x3d8] sm:$0xff]  ;;  %v2368_v23 = vpack.c.bf16 %v441_v17, %v433_v15  ;;  %v2178_v24 = vpack.c.bf16 %v456_v19, %v448_v18  ;;  %v447_v25 = vld [vmem:[%s3418_s10 + $0x380] sm:$0xff]  ;;  %v449_v27 = vld [vmem:[%s3418_s10 + $0x390] sm:$0xff] }
  0x8e   : > { %2169 = vmatpush1.bf16.msra.mxu0 %v2168_v62  ;;  %v455_v26 = vld [vmem:[%s3418_s10 + $0x3c0] sm:$0xff]  ;;  %v2370_v28 = vpack.c.bf16 %v458_v21, %v450_v20  ;;  %v457_v29 = vld [vmem:[%s3418_s10 + $0x3d0] sm:$0xff]  ;;  %v464_v30 = vld [vmem:[%s3418_s10 + $0x408] sm:$0xff] }
  0x8f   : > { %2361 = vmatpush1.bf16.msra.mxu1 %v2360_v63  ;;  %2171 = vmatprep.subr.bf16.mxu0 %v2170_v0  ;;  %v472_v31 = vld [vmem:[%s3418_s10 + $0x448] sm:$0xff]  ;;  %v466_v32 = vld [vmem:[%s3418_s10 + $0x418] sm:$0xff]  ;;  %v2180_v34 = vpack.c.bf16 %v455_v26, %v447_v25  ;;  %v2372_v35 = vpack.c.bf16 %v457_v29, %v449_v27  ;;  %v463_v37 = vld [vmem:[%s3418_s10 + $0x400] sm:$0xff] }
  0x90   : > { %2363 = vmatprep.subr.bf16.mxu1 %v2362_v4  ;;  %v474_v33 = vld [vmem:[%s3418_s10 + $0x458] sm:$0xff]  ;;  %v2182_v36 = vpack.c.bf16 %v472_v31, %v464_v30  ;;  %v471_v38 = vld [vmem:[%s3418_s10 + $0x440] sm:$0xff]  ;;  %v465_v39 = vld [vmem:[%s3418_s10 + $0x410] sm:$0xff] }
  0x91   : > { %v2374_v40 = vpack.c.bf16 %v474_v33, %v466_v32  ;;  %v473_v41 = vld [vmem:[%s3418_s10 + $0x450] sm:$0xff]  ;;  %v480_v42 = vld [vmem:[%s3418_s10 + $0x488] sm:$0xff]  ;;  %v482_v44 = vld [vmem:[%s3418_s10 + $0x498] sm:$0xff]  ;;  %v2184_v46 = vpack.c.bf16 %v471_v38, %v463_v37 }
  0x92   : > { %2173 = vmatpush1.bf16.msra.mxu0 %v2172_v10  ;;  %v488_v43 = vld [vmem:[%s3418_s10 + $0x4c8] sm:$0xff]  ;;  %v490_v45 = vld [vmem:[%s3418_s10 + $0x4d8] sm:$0xff]  ;;  %v2376_v47 = vpack.c.bf16 %v473_v41, %v465_v39  ;;  %v479_v49 = vld [vmem:[%s3418_s10 + $0x480] sm:$0xff] }
  0x93   : > { %2365 = vmatpush1.bf16.msra.mxu1 %v2364_v11  ;;  %2175 = vmatprep.subr.bf16.mxu0 %v2174_v12  ;;  %v2186_v48 = vpack.c.bf16 %v488_v43, %v480_v42  ;;  %v487_v50 = vld [vmem:[%s3418_s10 + $0x4c0] sm:$0xff]  ;;  %v481_v51 = vld [vmem:[%s3418_s10 + $0x490] sm:$0xff]  ;;  %v2378_v52 = vpack.c.bf16 %v490_v45, %v482_v44  ;;  %v496_v54 = vld [vmem:[%s3418_s10 + $0x508] sm:$0xff] }
  0x94   : > { %2367 = vmatprep.subr.bf16.mxu1 %v2366_v16  ;;  %v489_v53 = vld [vmem:[%s3418_s10 + $0x4d0] sm:$0xff]  ;;  %v504_v55 = vld [vmem:[%s3418_s10 + $0x548] sm:$0xff]  ;;  %v498_v56 = vld [vmem:[%s3418_s10 + $0x518] sm:$0xff]  ;;  %v2188_v58 = vpack.c.bf16 %v487_v50, %v479_v49 }
  0x95   : > { %v506_v57 = vld [vmem:[%s3418_s10 + $0x558] sm:$0xff]  ;;  %v2380_v59 = vpack.c.bf16 %v489_v53, %v481_v51  ;;  %v2190_v60 = vpack.c.bf16 %v504_v55, %v496_v54  ;;  %v495_v61 = vld [vmem:[%s3418_s10 + $0x500] sm:$0xff]  ;;  %v497_v63 = vld [vmem:[%s3418_s10 + $0x510] sm:$0xff] }
  0x96   : > { %2177 = vmatpush1.bf16.msra.mxu0 %v2176_v22  ;;  %v503_v62 = vld [vmem:[%s3418_s10 + $0x540] sm:$0xff]  ;;  %v2382_v0 = vpack.c.bf16 %v506_v57, %v498_v56  ;;  %v505_v1 = vld [vmem:[%s3418_s10 + $0x550] sm:$0xff]  ;;  %v512_v2 = vld [vmem:[%s3418_s10 + $0x588] sm:$0xff] }
  0x97   : > { %2369 = vmatpush1.bf16.msra.mxu1 %v2368_v23  ;;  %2179 = vmatprep.subr.bf16.mxu0 %v2178_v24  ;;  %v520_v3 = vld [vmem:[%s3418_s10 + $0x5c8] sm:$0xff]  ;;  %v514_v4 = vld [vmem:[%s3418_s10 + $0x598] sm:$0xff]  ;;  %v2192_v6 = vpack.c.bf16 %v503_v62, %v495_v61  ;;  %v511_v7 = vld [vmem:[%s3418_s10 + $0x580] sm:$0xff]  ;;  %v2384_v8 = vpack.c.bf16 %v505_v1, %v497_v63 }
  0x98   : > { %2371 = vmatprep.subr.bf16.mxu1 %v2370_v28  ;;  %v522_v5 = vld [vmem:[%s3418_s10 + $0x5d8] sm:$0xff]  ;;  %v2194_v9 = vpack.c.bf16 %v520_v3, %v512_v2  ;;  %v519_v10 = vld [vmem:[%s3418_s10 + $0x5c0] sm:$0xff]  ;;  %v513_v11 = vld [vmem:[%s3418_s10 + $0x590] sm:$0xff] }
  0x99   : > { %v521_v12 = vld [vmem:[%s3418_s10 + $0x5d0] sm:$0xff]  ;;  %v2386_v13 = vpack.c.bf16 %v522_v5, %v514_v4  ;;  %v528_v14 = vld [vmem:[%s3418_s10 + $0x608] sm:$0xff]  ;;  %v330_v16 = vld [vmem:[#allocation2 + $0x8] sm:$0xff]  ;;  %v2196_v19 = vpack.c.bf16 %v519_v10, %v511_v7 }
  0x9a   : > { %2181 = vmatpush1.bf16.msra.mxu0 %v2180_v34  ;;  %v536_v15 = vld [vmem:[%s3418_s10 + $0x648] sm:$0xff]  ;;  %v530_v17 = vld [vmem:[%s3418_s10 + $0x618] sm:$0xff]  ;;  %1167 = vmatprep.mubr.f32.mxu0 %v330_v16  ;;  %v2388_v20 = vpack.c.bf16 %v521_v12, %v513_v11  ;;  %v527_v22 = vld [vmem:[%s3418_s10 + $0x600] sm:$0xff] }
  0x9b   : > { %2373 = vmatpush1.bf16.msra.mxu1 %v2372_v35  ;;  %2183 = vmatprep.subr.bf16.mxu0 %v2182_v36  ;;  %v538_v18 = vld [vmem:[%s3418_s10 + $0x658] sm:$0xff]  ;;  %v2198_v21 = vpack.c.bf16 %v536_v15, %v528_v14  ;;  %v535_v23 = vld [vmem:[%s3418_s10 + $0x640] sm:$0xff]  ;;  %v529_v24 = vld [vmem:[%s3418_s10 + $0x610] sm:$0xff] }
  0x9c   : > { %2375 = vmatprep.subr.bf16.mxu1 %v2374_v40  ;;  %1380 = vmatprep.mubr.f32.mxu1 %v330_v16  ;;  %v2390_v25 = vpack.c.bf16 %v538_v18, %v530_v17  ;;  %v537_v26 = vld [vmem:[%s3418_s10 + $0x650] sm:$0xff]  ;;  %v544_v27 = vld [vmem:[%s3418_s10 + $0x688] sm:$0xff]  ;;  %v546_v29 = vld [vmem:[%s3418_s10 + $0x698] sm:$0xff]  ;;  %v2200_v31 = vpack.c.bf16 %v535_v23, %v527_v22 }
  0x9d   : > { %v552_v28 = vld [vmem:[%s3418_s10 + $0x6c8] sm:$0xff]  ;;  %v554_v30 = vld [vmem:[%s3418_s10 + $0x6d8] sm:$0xff]  ;;  %v2392_v32 = vpack.c.bf16 %v537_v26, %v529_v24  ;;  %v543_v34 = vld [vmem:[%s3418_s10 + $0x680] sm:$0xff] }
  0x9e   : > { %2185 = vmatpush1.bf16.msra.mxu0 %v2184_v46  ;;  %v2202_v33 = vpack.c.bf16 %v552_v28, %v544_v27  ;;  %v551_v35 = vld [vmem:[%s3418_s10 + $0x6c0] sm:$0xff]  ;;  %v545_v36 = vld [vmem:[%s3418_s10 + $0x690] sm:$0xff]  ;;  %v2394_v37 = vpack.c.bf16 %v554_v30, %v546_v29  ;;  %v560_v39 = vld [vmem:[%s3418_s10 + $0x708] sm:$0xff] }
  0x9f   : > { %2377 = vmatpush1.bf16.msra.mxu1 %v2376_v47  ;;  %2187 = vmatprep.subr.bf16.mxu0 %v2186_v48  ;;  %v553_v38 = vld [vmem:[%s3418_s10 + $0x6d0] sm:$0xff]  ;;  %v568_v40 = vld [vmem:[%s3418_s10 + $0x748] sm:$0xff]  ;;  %v562_v41 = vld [vmem:[%s3418_s10 + $0x718] sm:$0xff]  ;;  %v2204_v43 = vpack.c.bf16 %v551_v35, %v543_v34 }
  0xa0   : > { %2379 = vmatprep.subr.bf16.mxu1 %v2378_v52  ;;  %v570_v42 = vld [vmem:[%s3418_s10 + $0x758] sm:$0xff]  ;;  %v2396_v44 = vpack.c.bf16 %v553_v38, %v545_v36  ;;  %v2206_v45 = vpack.c.bf16 %v568_v40, %v560_v39  ;;  %v559_v46 = vld [vmem:[%s3418_s10 + $0x700] sm:$0xff]  ;;  %v561_v48 = vld [vmem:[%s3418_s10 + $0x710] sm:$0xff] }
  0xa1   : > { %v567_v47 = vld [vmem:[%s3418_s10 + $0x740] sm:$0xff]  ;;  %v2398_v49 = vpack.c.bf16 %v570_v42, %v562_v41  ;;  %v569_v50 = vld [vmem:[%s3418_s10 + $0x750] sm:$0xff]  ;;  %v576_v51 = vld [vmem:[%s3418_s10 + $0x788] sm:$0xff] }
  0xa2   : > { %2189 = vmatpush1.bf16.msra.mxu0 %v2188_v58  ;;  %v584_v52 = vld [vmem:[%s3418_s10 + $0x7c8] sm:$0xff]  ;;  %v578_v53 = vld [vmem:[%s3418_s10 + $0x798] sm:$0xff]  ;;  %v2208_v55 = vpack.c.bf16 %v567_v47, %v559_v46  ;;  %v2400_v56 = vpack.c.bf16 %v569_v50, %v561_v48  ;;  %v575_v58 = vld [vmem:[%s3418_s10 + $0x780] sm:$0xff] }
  0xa3   : > { %2381 = vmatpush1.bf16.msra.mxu1 %v2380_v59  ;;  %2191 = vmatprep.subr.bf16.mxu0 %v2190_v60  ;;  %v586_v54 = vld [vmem:[%s3418_s10 + $0x7d8] sm:$0xff]  ;;  %v2210_v57 = vpack.c.bf16 %v584_v52, %v576_v51  ;;  %v583_v59 = vld [vmem:[%s3418_s10 + $0x7c0] sm:$0xff]  ;;  %v577_v60 = vld [vmem:[%s3418_s10 + $0x790] sm:$0xff] }
  0xa4   : > { %2383 = vmatprep.subr.bf16.mxu1 %v2382_v0  ;;  %v2402_v61 = vpack.c.bf16 %v586_v54, %v578_v53  ;;  %v585_v62 = vld [vmem:[%s3418_s10 + $0x7d0] sm:$0xff]  ;;  %v592_v63 = vld [vmem:[%s3418_s10 + $0x808] sm:$0xff]  ;;  %v594_v1 = vld [vmem:[%s3418_s10 + $0x818] sm:$0xff]  ;;  %v2212_v3 = vpack.c.bf16 %v583_v59, %v575_v58 }
  0xa5   : > { %v600_v0 = vld [vmem:[%s3418_s10 + $0x848] sm:$0xff]  ;;  %v602_v2 = vld [vmem:[%s3418_s10 + $0x858] sm:$0xff]  ;;  %v2404_v4 = vpack.c.bf16 %v585_v62, %v577_v60  ;;  %v599_v7 = vld [vmem:[%s3418_s10 + $0x840] sm:$0xff] }
  0xa6   : > { %2193 = vmatpush1.bf16.msra.mxu0 %v2192_v6  ;;  %v2214_v5 = vpack.c.bf16 %v600_v0, %v592_v63  ;;  %v591_v6 = vld [vmem:[%s3418_s10 + $0x800] sm:$0xff]  ;;  %v601_v10 = vld [vmem:[%s3418_s10 + $0x850] sm:$0xff]  ;;  %v608_v11 = vld [vmem:[%s3418_s10 + $0x888] sm:$0xff] }
  0xa7   : > { %2385 = vmatpush1.bf16.msra.mxu1 %v2384_v8  ;;  %2195 = vmatprep.subr.bf16.mxu0 %v2194_v9  ;;  %v593_v8 = vld [vmem:[%s3418_s10 + $0x810] sm:$0xff]  ;;  %v2406_v9 = vpack.c.bf16 %v602_v2, %v594_v1  ;;  %v616_v12 = vld [vmem:[%s3418_s10 + $0x8c8] sm:$0xff]  ;;  %v618_v14 = vld [vmem:[%s3418_s10 + $0x8d8] sm:$0xff]  ;;  %v2216_v16 = vpack.c.bf16 %v599_v7, %v591_v6 }
  0xa8   : > { %2387 = vmatprep.subr.bf16.mxu1 %v2386_v13  ;;  %v610_v13 = vld [vmem:[%s3418_s10 + $0x898] sm:$0xff]  ;;  %v329_v15 = vld [vmem:[#allocation2] sm:$0xff]  ;;  %v2408_v17 = vpack.c.bf16 %v601_v10, %v593_v8  ;;  %v2218_v18 = vpack.c.bf16 %v616_v12, %v608_v11  ;;  %v624_v24 = vld [vmem:[%s3418_s10 + $0x908] sm:$0xff] }
  0xa9   : > { %v2410_v22 = vpack.c.bf16 %v618_v14, %v610_v13  ;;  %v617_v23 = vld [vmem:[%s3418_s10 + $0x8d0] sm:$0xff]  ;;  %v626_v26 = vld [vmem:[%s3418_s10 + $0x918] sm:$0xff]  ;;  %v640_v36 = vld [vmem:[%s3418_s10 + $0x988] sm:$0xff] }
  0xaa   : > { %2197 = vmatpush1.bf16.msra.mxu0 %v2196_v19  ;;  %v607_v19 = vld [vmem:[%s3418_s10 + $0x880] sm:$0xff]  ;;  %v634_v27 = vld [vmem:[%s3418_s10 + $0x958] sm:$0xff]  ;;  %v633_v35 = vld [vmem:[%s3418_s10 + $0x950] sm:$0xff] }
  0xab   : > { %2389 = vmatpush1.bf16.msra.mxu1 %v2388_v20  ;;  %2199 = vmatprep.subr.bf16.mxu0 %v2198_v21  ;;  %v615_v20 = vld [vmem:[%s3418_s10 + $0x8c0] sm:$0xff]  ;;  %v609_v21 = vld [vmem:[%s3418_s10 + $0x890] sm:$0xff]  ;;  %v2414_v34 = vpack.c.bf16 %v634_v27, %v626_v26  ;;  %v642_v38 = vld [vmem:[%s3418_s10 + $0x998] sm:$0xff] }
  0xac   : > { %2391 = vmatprep.subr.bf16.mxu1 %v2390_v25  ;;  %v632_v25 = vld [vmem:[%s3418_s10 + $0x948] sm:$0xff]  ;;  %v2220_v28 = vpack.c.bf16 %v615_v20, %v607_v19  ;;  %v2412_v29 = vpack.c.bf16 %v617_v23, %v609_v21  ;;  %v650_v39 = vld [vmem:[%s3418_s10 + $0x9d8] sm:$0xff]  ;;  %v649_v47 = vld [vmem:[%s3418_s10 + $0x9d0] sm:$0xff] }
  0xad   : > { %v2222_v30 = vpack.c.bf16 %v632_v25, %v624_v24  ;;  %v2418_v46 = vpack.c.bf16 %v650_v39, %v642_v38  ;;  %v656_v48 = vld [vmem:[%s3418_s10 + $0xa08] sm:$0xff]  ;;  %v658_v50 = vld [vmem:[%s3418_s10 + $0xa18] sm:$0xff]  ;;  %v665_v59 = vld [vmem:[%s3418_s10 + $0xa50] sm:$0xff] }
  0xae   : > { %2201 = vmatpush1.bf16.msra.mxu0 %v2200_v31  ;;  %v623_v31 = vld [vmem:[%s3418_s10 + $0x900] sm:$0xff]  ;;  %v666_v51 = vld [vmem:[%s3418_s10 + $0xa58] sm:$0xff]  ;;  %v672_v60 = vld [vmem:[%s3418_s10 + $0xa88] sm:$0xff] }
  0xaf   : > { %2393 = vmatpush1.bf16.msra.mxu1 %v2392_v32  ;;  %2203 = vmatprep.subr.bf16.mxu0 %v2202_v33  ;;  %v631_v32 = vld [vmem:[%s3418_s10 + $0x940] sm:$0xff]  ;;  %v625_v33 = vld [vmem:[%s3418_s10 + $0x910] sm:$0xff]  ;;  %v2422_v58 = vpack.c.bf16 %v666_v51, %v658_v50  ;;  %v674_v62 = vld [vmem:[%s3418_s10 + $0xa98] sm:$0xff] }
  0xb0   : > { %2395 = vmatprep.subr.bf16.mxu1 %v2394_v37  ;;  %v648_v37 = vld [vmem:[%s3418_s10 + $0x9c8] sm:$0xff]  ;;  %v2224_v40 = vpack.c.bf16 %v631_v32, %v623_v31  ;;  %v2416_v41 = vpack.c.bf16 %v633_v35, %v625_v33  ;;  %v682_v63 = vld [vmem:[%s3418_s10 + $0xad8] sm:$0xff]  ;;  %v681_v7 = vld [vmem:[%s3418_s10 + $0xad0] sm:$0xff] }
  0xb1   : > { %v2226_v42 = vpack.c.bf16 %v648_v37, %v640_v36  ;;  %v2426_v6 = vpack.c.bf16 %v682_v63, %v674_v62  ;;  %v688_v8 = vld [vmem:[%s3418_s10 + $0xb08] sm:$0xff]  ;;  %v690_v10 = vld [vmem:[%s3418_s10 + $0xb18] sm:$0xff]  ;;  %v687_v13 = vld [vmem:[%s3418_s10 + $0xb00] sm:$0xff] }
  0xb2   : > { %2205 = vmatpush1.bf16.msra.mxu0 %v2204_v43  ;;  %v639_v43 = vld [vmem:[%s3418_s10 + $0x980] sm:$0xff]  ;;  %v698_v11 = vld [vmem:[%s3418_s10 + $0xb58] sm:$0xff]  ;;  %v704_v20 = vld [vmem:[%s3418_s10 + $0xb88] sm:$0xff] }
  0xb3   : > { %2397 = vmatpush1.bf16.msra.mxu1 %v2396_v44  ;;  %2207 = vmatprep.subr.bf16.mxu0 %v2206_v45  ;;  %v647_v44 = vld [vmem:[%s3418_s10 + $0x9c0] sm:$0xff]  ;;  %v641_v45 = vld [vmem:[%s3418_s10 + $0x990] sm:$0xff]  ;;  %v2430_v19 = vpack.c.bf16 %v698_v11, %v690_v10  ;;  %v712_v21 = vld [vmem:[%s3418_s10 + $0xbc8] sm:$0xff] }
  0xb4   : > { %2399 = vmatprep.subr.bf16.mxu1 %v2398_v49  ;;  %v664_v49 = vld [vmem:[%s3418_s10 + $0xa48] sm:$0xff]  ;;  %v2228_v52 = vpack.c.bf16 %v647_v44, %v639_v43  ;;  %v2420_v53 = vpack.c.bf16 %v649_v47, %v641_v45  ;;  %v706_v23 = vld [vmem:[%s3418_s10 + $0xb98] sm:$0xff]  ;;  %v2242_v27 = vpack.c.bf16 %v712_v21, %v704_v20  ;;  %v713_v32 = vld [vmem:[%s3418_s10 + $0xbd0] sm:$0xff] }
  0xb5   : > { %v2230_v54 = vpack.c.bf16 %v664_v49, %v656_v48  ;;  %v714_v24 = vld [vmem:[%s3418_s10 + $0xbd8] sm:$0xff]  ;;  %v720_v33 = vld [vmem:[%s3418_s10 + $0xc08] sm:$0xff]  ;;  %v729_v44 = vld [vmem:[%s3418_s10 + $0xc50] sm:$0xff] }
  0xb6   : > { %2209 = vmatpush1.bf16.msra.mxu0 %v2208_v55  ;;  %v655_v55 = vld [vmem:[%s3418_s10 + $0xa00] sm:$0xff]  ;;  %v2434_v31 = vpack.c.bf16 %v714_v24, %v706_v23  ;;  %v722_v35 = vld [vmem:[%s3418_s10 + $0xc18] sm:$0xff]  ;;  %v736_v45 = vld [vmem:[%s3418_s10 + $0xc88] sm:$0xff] }
  0xb7   : > { %2401 = vmatpush1.bf16.msra.mxu1 %v2400_v56  ;;  %2211 = vmatprep.subr.bf16.mxu0 %v2210_v57  ;;  %v663_v56 = vld [vmem:[%s3418_s10 + $0xa40] sm:$0xff]  ;;  %v657_v57 = vld [vmem:[%s3418_s10 + $0xa10] sm:$0xff]  ;;  %v730_v36 = vld [vmem:[%s3418_s10 + $0xc58] sm:$0xff] }
  0xb8   : > { %2403 = vmatprep.subr.bf16.mxu1 %v2402_v61  ;;  %v680_v61 = vld [vmem:[%s3418_s10 + $0xac8] sm:$0xff]  ;;  %v2232_v0 = vpack.c.bf16 %v663_v56, %v655_v55  ;;  %v2424_v1 = vpack.c.bf16 %v665_v59, %v657_v57  ;;  %v2438_v43 = vpack.c.bf16 %v730_v36, %v722_v35  ;;  %v738_v47 = vld [vmem:[%s3418_s10 + $0xc98] sm:$0xff]  ;;  %v745_v56 = vld [vmem:[%s3418_s10 + $0xcd0] sm:$0xff] }
  0xb9   : > { %v2234_v2 = vpack.c.bf16 %v680_v61, %v672_v60  ;;  %v746_v48 = vld [vmem:[%s3418_s10 + $0xcd8] sm:$0xff]  ;;  %v752_v57 = vld [vmem:[%s3418_s10 + $0xd08] sm:$0xff]  ;;  %v783_v24 = vld [vmem:[%s3418_s10 + $0xe00] sm:$0xff] }
  0xba   : > { %2213 = vmatpush1.bf16.msra.mxu0 %v2212_v3  ;;  %v671_v3 = vld [vmem:[%s3418_s10 + $0xa80] sm:$0xff]  ;;  %v2442_v55 = vpack.c.bf16 %v746_v48, %v738_v47  ;;  %v754_v59 = vld [vmem:[%s3418_s10 + $0xd18] sm:$0xff] }
  0xbb   : > { %2405 = vmatpush1.bf16.msra.mxu1 %v2404_v4  ;;  %2215 = vmatprep.subr.bf16.mxu0 %v2214_v5  ;;  %v679_v4 = vld [vmem:[%s3418_s10 + $0xac0] sm:$0xff]  ;;  %v673_v5 = vld [vmem:[%s3418_s10 + $0xa90] sm:$0xff]  ;;  %v762_v60 = vld [vmem:[%s3418_s10 + $0xd58] sm:$0xff] }
  0xbc   : > { %2407 = vmatprep.subr.bf16.mxu1 %v2406_v9  ;;  %v696_v9 = vld [vmem:[%s3418_s10 + $0xb48] sm:$0xff]  ;;  %v2236_v12 = vpack.c.bf16 %v679_v4, %v671_v3  ;;  %v2428_v14 = vpack.c.bf16 %v681_v7, %v673_v5  ;;  %v2446_v3 = vpack.c.bf16 %v762_v60, %v754_v59  ;;  %v761_v4 = vld [vmem:[%s3418_s10 + $0xd50] sm:$0xff]  ;;  %v770_v7 = vld [vmem:[%s3418_s10 + $0xd98] sm:$0xff] }
  0xbd   : > { %1168 = vmatmul.mubr.f32.vlgmr.msra.gmra.mrb[0].mxu0 %v329_v15  ;;  %v768_v5 = vld [vmem:[%s3418_s10 + $0xd88] sm:$0xff]  ;;  %v794_v20 = vld [vmem:[%s3418_s10 + $0xe58] sm:$0xff]  ;;  %v799_v36 = vld [vmem:[%s3418_s10 + $0xe80] sm:$0xff] }
  0xbe   : > { %2217 = vmatpush1.bf16.msra.mxu0 %v2216_v16  ;;  %1381 = vmatmul.mubr.f32.vlgmr.msra.gmra.mrb[0].mxu1 %v329_v15  ;;  %v2238_v15 = vpack.c.bf16 %v696_v9, %v688_v8  ;;  %v695_v16 = vld [vmem:[%s3418_s10 + $0xb40] sm:$0xff]  ;;  %v778_v8 = vld [vmem:[%s3418_s10 + $0xdd8] sm:$0xff] }
  0xbf   : > { %2409 = vmatpush1.bf16.msra.mxu1 %v2408_v17  ;;  %2219 = vmatprep.subr.bf16.mxu0 %v2218_v18  ;;  %v689_v17 = vld [vmem:[%s3418_s10 + $0xb10] sm:$0xff]  ;;  %v2240_v25 = vpack.c.bf16 %v695_v16, %v687_v13  ;;  %v775_v13 = vld [vmem:[%s3418_s10 + $0xdc0] sm:$0xff] }
  0xc0   : > { %2411 = vmatprep.subr.bf16.mxu1 %v2410_v22  ;;  %v697_v18 = vld [vmem:[%s3418_s10 + $0xb50] sm:$0xff]  ;;  %v332_v22 = vld [vmem:[#allocation2 + $0x18] sm:$0xff]  ;;  %v815_v48 = vld [vmem:[%s3418_s10 + $0xf00] sm:$0xff] }
  0xc1   : > { %1238 = vmatprep.mubr.f32.mxu0 %v332_v22  ;;  %1451 = vmatprep.mubr.f32.mxu1 %v332_v22  ;;  %v2432_v26 = vpack.c.bf16 %v697_v18, %v689_v17  ;;  %v777_v16 = vld [vmem:[%s3418_s10 + $0xdd0] sm:$0xff]  ;;  %v784_v17 = vld [vmem:[%s3418_s10 + $0xe08] sm:$0xff]  ;;  %v831_v60 = vld [vmem:[%s3418_s10 + $0xf80] sm:$0xff] }
  0xc2   : > { %2221 = vmatpush1.bf16.msra.mxu0 %v2220_v28  ;;  %v703_v28 = vld [vmem:[%s3418_s10 + $0xb80] sm:$0xff]  ;;  %v792_v18 = vld [vmem:[%s3418_s10 + $0xe48] sm:$0xff] }
  0xc3   : > { %2413 = vmatpush1.bf16.msra.mxu1 %v2412_v29  ;;  %2223 = vmatprep.subr.bf16.mxu0 %v2222_v30  ;;  %v711_v29 = vld [vmem:[%s3418_s10 + $0xbc0] sm:$0xff]  ;;  %v705_v30 = vld [vmem:[%s3418_s10 + $0xb90] sm:$0xff]  ;;  %v2262_v23 = vpack.c.bf16 %v792_v18, %v784_v17 }
  0xc4   : > { %2415 = vmatprep.subr.bf16.mxu1 %v2414_v34  ;;  %v728_v34 = vld [vmem:[%s3418_s10 + $0xc48] sm:$0xff]  ;;  %v2244_v37 = vpack.c.bf16 %v711_v29, %v703_v28  ;;  %v2436_v38 = vpack.c.bf16 %v713_v32, %v705_v30  ;;  %v793_v28 = vld [vmem:[%s3418_s10 + $0xe50] sm:$0xff]  ;;  %v810_v32 = vld [vmem:[%s3418_s10 + $0xed8] sm:$0xff] }
  0xc5   : > { %v2246_v39 = vpack.c.bf16 %v728_v34, %v720_v33  ;;  %v800_v29 = vld [vmem:[%s3418_s10 + $0xe88] sm:$0xff]  ;;  %v331_v17 = vld [vmem:[#allocation2 + $0x10] sm:$0xff] }
  0xc6   : > { %2225 = vmatpush1.bf16.msra.mxu0 %v2224_v40  ;;  %v719_v40 = vld [vmem:[%s3418_s10 + $0xc00] sm:$0xff]  ;;  %v808_v30 = vld [vmem:[%s3418_s10 + $0xec8] sm:$0xff] }
  0xc7   : > { %2417 = vmatpush1.bf16.msra.mxu1 %v2416_v41  ;;  %2227 = vmatprep.subr.bf16.mxu0 %v2226_v42  ;;  %v727_v41 = vld [vmem:[%s3418_s10 + $0xc40] sm:$0xff]  ;;  %v721_v42 = vld [vmem:[%s3418_s10 + $0xc10] sm:$0xff]  ;;  %v2266_v35 = vpack.c.bf16 %v808_v30, %v800_v29  ;;  %v890_v29 = vld [vmem:[%s3418_s10 + $0x1158] sm:$0xff] }
  0xc8   : > { %2419 = vmatprep.subr.bf16.mxu1 %v2418_v46  ;;  %v744_v46 = vld [vmem:[%s3418_s10 + $0xcc8] sm:$0xff]  ;;  %v2248_v49 = vpack.c.bf16 %v727_v41, %v719_v40  ;;  %v2440_v50 = vpack.c.bf16 %v729_v44, %v721_v42  ;;  %v809_v40 = vld [vmem:[%s3418_s10 + $0xed0] sm:$0xff]  ;;  %v826_v44 = vld [vmem:[%s3418_s10 + $0xf58] sm:$0xff] }
  0xc9   : > { %v2250_v51 = vpack.c.bf16 %v744_v46, %v736_v45  ;;  %v816_v41 = vld [vmem:[%s3418_s10 + $0xf08] sm:$0xff]  ;;  %v334_v30 = vld [vmem:[#allocation2 + $0x28] sm:$0xff] }
  0xca   : > { %2229 = vmatpush1.bf16.msra.mxu0 %v2228_v52  ;;  %v735_v52 = vld [vmem:[%s3418_s10 + $0xc80] sm:$0xff]  ;;  %v824_v42 = vld [vmem:[%s3418_s10 + $0xf48] sm:$0xff] }
  0xcb   : > { %2421 = vmatpush1.bf16.msra.mxu1 %v2420_v53  ;;  %2231 = vmatprep.subr.bf16.mxu0 %v2230_v54  ;;  %v743_v53 = vld [vmem:[%s3418_s10 + $0xcc0] sm:$0xff]  ;;  %v737_v54 = vld [vmem:[%s3418_s10 + $0xc90] sm:$0xff]  ;;  %v2270_v47 = vpack.c.bf16 %v824_v42, %v816_v41  ;;  %v898_v41 = vld [vmem:[%s3418_s10 + $0x1198] sm:$0xff] }
  0xcc   : > { %2423 = vmatprep.subr.bf16.mxu1 %v2422_v58  ;;  %v760_v58 = vld [vmem:[%s3418_s10 + $0xd48] sm:$0xff]  ;;  %v2252_v61 = vpack.c.bf16 %v743_v53, %v735_v52  ;;  %v2444_v62 = vpack.c.bf16 %v745_v56, %v737_v54  ;;  %v825_v52 = vld [vmem:[%s3418_s10 + $0xf50] sm:$0xff]  ;;  %v842_v56 = vld [vmem:[%s3418_s10 + $0xfd8] sm:$0xff] }
  0xcd   : > { %v2254_v63 = vpack.c.bf16 %v760_v58, %v752_v57  ;;  %v832_v53 = vld [vmem:[%s3418_s10 + $0xf88] sm:$0xff]  ;;  %v906_v42 = vld [vmem:[%s3418_s10 + $0x11d8] sm:$0xff] }
  0xce   : > { %2233 = vmatpush1.bf16.msra.mxu0 %v2232_v0  ;;  %v751_v0 = vld [vmem:[%s3418_s10 + $0xd00] sm:$0xff]  ;;  %v840_v54 = vld [vmem:[%s3418_s10 + $0xfc8] sm:$0xff] }
  0xcf   : > { %2425 = vmatpush1.bf16.msra.mxu1 %v2424_v1  ;;  %2235 = vmatprep.subr.bf16.mxu0 %v2234_v2  ;;  %v759_v1 = vld [vmem:[%s3418_s10 + $0xd40] sm:$0xff]  ;;  %v753_v2 = vld [vmem:[%s3418_s10 + $0xd10] sm:$0xff]  ;;  %v2274_v59 = vpack.c.bf16 %v840_v54, %v832_v53  ;;  %v914_v53 = vld [vmem:[%s3418_s10 + $0x1218] sm:$0xff] }
  0xd0   : > { %2427 = vmatprep.subr.bf16.mxu1 %v2426_v6  ;;  %v776_v6 = vld [vmem:[%s3418_s10 + $0xdc8] sm:$0xff]  ;;  %v2256_v9 = vpack.c.bf16 %v759_v1, %v751_v0  ;;  %v2448_v10 = vpack.c.bf16 %v761_v4, %v753_v2  ;;  %v841_v0 = vld [vmem:[%s3418_s10 + $0xfd0] sm:$0xff]  ;;  %v858_v4 = vld [vmem:[%s3418_s10 + $0x1058] sm:$0xff] }
  0xd1   : > { %v2258_v11 = vpack.c.bf16 %v776_v6, %v768_v5  ;;  %v848_v1 = vld [vmem:[%s3418_s10 + $0x1008] sm:$0xff]  ;;  %v922_v54 = vld [vmem:[%s3418_s10 + $0x1258] sm:$0xff] }
  0xd2   : > { %2237 = vmatpush1.bf16.msra.mxu0 %v2236_v12  ;;  %v767_v12 = vld [vmem:[%s3418_s10 + $0xd80] sm:$0xff]  ;;  %v856_v2 = vld [vmem:[%s3418_s10 + $0x1048] sm:$0xff] }
  0xd3   : > { %2429 = vmatpush1.bf16.msra.mxu1 %v2428_v14  ;;  %2239 = vmatprep.subr.bf16.mxu0 %v2238_v15  ;;  %v769_v14 = vld [vmem:[%s3418_s10 + $0xd90] sm:$0xff]  ;;  %v2450_v15 = vpack.c.bf16 %v778_v8, %v770_v7  ;;  %v2260_v21 = vpack.c.bf16 %v775_v13, %v767_v12  ;;  %v2278_v7 = vpack.c.bf16 %v856_v2, %v848_v1  ;;  %v847_v8 = vld [vmem:[%s3418_s10 + $0x1000] sm:$0xff]  ;;  %v864_v13 = vld [vmem:[%s3418_s10 + $0x1088] sm:$0xff] }
  0xd4   : > { %2431 = vmatprep.subr.bf16.mxu1 %v2430_v19  ;;  %v786_v19 = vld [vmem:[%s3418_s10 + $0xe18] sm:$0xff]  ;;  %v2452_v22 = vpack.c.bf16 %v777_v16, %v769_v14  ;;  %v857_v12 = vld [vmem:[%s3418_s10 + $0x1050] sm:$0xff]  ;;  %v872_v14 = vld [vmem:[%s3418_s10 + $0x10c8] sm:$0xff] }
  0xd5   : > { %v874_v16 = vld [vmem:[%s3418_s10 + $0x10d8] sm:$0xff] }
  0xd6   : > { %2241 = vmatpush1.bf16.msra.mxu0 %v2240_v25  ;;  %v791_v25 = vld [vmem:[%s3418_s10 + $0xe40] sm:$0xff]  ;;  %v930_v1 = vld [vmem:[%s3418_s10 + $0x1298] sm:$0xff] }
  0xd7   : > { %2433 = vmatpush1.bf16.msra.mxu1 %v2432_v26  ;;  %2243 = vmatprep.subr.bf16.mxu0 %v2242_v27  ;;  %v785_v26 = vld [vmem:[%s3418_s10 + $0xe10] sm:$0xff]  ;;  %v2454_v27 = vpack.c.bf16 %v794_v20, %v786_v19  ;;  %v2264_v33 = vpack.c.bf16 %v791_v25, %v783_v24  ;;  %v2282_v20 = vpack.c.bf16 %v872_v14, %v864_v13  ;;  %v938_v2 = vld [vmem:[%s3418_s10 + $0x12d8] sm:$0xff] }
  0xd8   : > { %2435 = vmatprep.subr.bf16.mxu1 %v2434_v31  ;;  %v802_v31 = vld [vmem:[%s3418_s10 + $0xe98] sm:$0xff]  ;;  %v2456_v34 = vpack.c.bf16 %v793_v28, %v785_v26  ;;  %v873_v25 = vld [vmem:[%s3418_s10 + $0x10d0] sm:$0xff]  ;;  %v880_v26 = vld [vmem:[%s3418_s10 + $0x1108] sm:$0xff] }
  0xd9   : > { %v882_v28 = vld [vmem:[%s3418_s10 + $0x1118] sm:$0xff] }
  0xda   : > { %2245 = vmatpush1.bf16.msra.mxu0 %v2244_v37  ;;  %v807_v37 = vld [vmem:[%s3418_s10 + $0xec0] sm:$0xff]  ;;  %v946_v13 = vld [vmem:[%s3418_s10 + $0x1318] sm:$0xff] }
  0xdb   : > { %2437 = vmatpush1.bf16.msra.mxu1 %v2436_v38  ;;  %2247 = vmatprep.subr.bf16.mxu0 %v2246_v39  ;;  %v801_v38 = vld [vmem:[%s3418_s10 + $0xe90] sm:$0xff]  ;;  %v2458_v39 = vpack.c.bf16 %v810_v32, %v802_v31  ;;  %v2268_v45 = vpack.c.bf16 %v807_v37, %v799_v36  ;;  %v2478_v37 = vpack.c.bf16 %v890_v29, %v882_v28  ;;  %v954_v14 = vld [vmem:[%s3418_s10 + $0x1358] sm:$0xff] }
  0xdc   : > { %2439 = vmatprep.subr.bf16.mxu1 %v2438_v43  ;;  %v818_v43 = vld [vmem:[%s3418_s10 + $0xf18] sm:$0xff]  ;;  %v2460_v46 = vpack.c.bf16 %v809_v40, %v801_v38  ;;  %v881_v36 = vld [vmem:[%s3418_s10 + $0x1110] sm:$0xff]  ;;  %v904_v40 = vld [vmem:[%s3418_s10 + $0x11c8] sm:$0xff] }
  0xdd   : > { %v889_v38 = vld [vmem:[%s3418_s10 + $0x1150] sm:$0xff] }
  0xde   : > { %2249 = vmatpush1.bf16.msra.mxu0 %v2248_v49  ;;  %v823_v49 = vld [vmem:[%s3418_s10 + $0xf40] sm:$0xff] }
  0xdf   : > { %2441 = vmatpush1.bf16.msra.mxu1 %v2440_v50  ;;  %2251 = vmatprep.subr.bf16.mxu0 %v2250_v51  ;;  %v817_v50 = vld [vmem:[%s3418_s10 + $0xf10] sm:$0xff]  ;;  %v2462_v51 = vpack.c.bf16 %v826_v44, %v818_v43  ;;  %v2272_v57 = vpack.c.bf16 %v823_v49, %v815_v48  ;;  %v2480_v44 = vpack.c.bf16 %v889_v38, %v881_v36  ;;  %v984_v36 = vld [vmem:[%s3418_s10 + $0x1448] sm:$0xff]  ;;  %v986_v38 = vld [vmem:[%s3418_s10 + $0x1458] sm:$0xff] }
  0xe0   : > { %2443 = vmatprep.subr.bf16.mxu1 %v2442_v55  ;;  %v834_v55 = vld [vmem:[%s3418_s10 + $0xf98] sm:$0xff]  ;;  %v2464_v58 = vpack.c.bf16 %v825_v52, %v817_v50  ;;  %v897_v48 = vld [vmem:[%s3418_s10 + $0x1190] sm:$0xff]  ;;  %v2482_v49 = vpack.c.bf16 %v906_v42, %v898_v41  ;;  %v920_v52 = vld [vmem:[%s3418_s10 + $0x1248] sm:$0xff] }
  0xe1   : > { %v905_v50 = vld [vmem:[%s3418_s10 + $0x11d0] sm:$0xff]  ;;  %v975_v42 = vld [vmem:[%s3418_s10 + $0x1400] sm:$0xff] }
  0xe2   : > { %2253 = vmatpush1.bf16.msra.mxu0 %v2252_v61  ;;  %v839_v61 = vld [vmem:[%s3418_s10 + $0xfc0] sm:$0xff] }
  0xe3   : > { %2445 = vmatpush1.bf16.msra.mxu1 %v2444_v62  ;;  %2255 = vmatprep.subr.bf16.mxu0 %v2254_v63  ;;  %v833_v62 = vld [vmem:[%s3418_s10 + $0xf90] sm:$0xff]  ;;  %v2466_v63 = vpack.c.bf16 %v842_v56, %v834_v55  ;;  %v2276_v5 = vpack.c.bf16 %v839_v61, %v831_v60  ;;  %v2484_v56 = vpack.c.bf16 %v905_v50, %v897_v48  ;;  %v1000_v48 = vld [vmem:[%s3418_s10 + $0x14c8] sm:$0xff]  ;;  %v1002_v50 = vld [vmem:[%s3418_s10 + $0x14d8] sm:$0xff] }
  0xe4   : > { %2447 = vmatprep.subr.bf16.mxu1 %v2446_v3  ;;  %v850_v3 = vld [vmem:[%s3418_s10 + $0x1018] sm:$0xff]  ;;  %v2468_v6 = vpack.c.bf16 %v841_v0, %v833_v62  ;;  %v913_v60 = vld [vmem:[%s3418_s10 + $0x1210] sm:$0xff]  ;;  %v2486_v61 = vpack.c.bf16 %v922_v54, %v914_v53  ;;  %v936_v0 = vld [vmem:[%s3418_s10 + $0x12c8] sm:$0xff] }
  0xe5   : > { %v921_v62 = vld [vmem:[%s3418_s10 + $0x1250] sm:$0xff]  ;;  %v991_v54 = vld [vmem:[%s3418_s10 + $0x1480] sm:$0xff] }
  0xe6   : > { %2257 = vmatpush1.bf16.msra.mxu0 %v2256_v9  ;;  %v855_v9 = vld [vmem:[%s3418_s10 + $0x1040] sm:$0xff] }
  0xe7   : > { %2449 = vmatpush1.bf16.msra.mxu1 %v2448_v10  ;;  %2259 = vmatprep.subr.bf16.mxu0 %v2258_v11  ;;  %v849_v10 = vld [vmem:[%s3418_s10 + $0x1010] sm:$0xff]  ;;  %v2470_v11 = vpack.c.bf16 %v858_v4, %v850_v3  ;;  %v2280_v18 = vpack.c.bf16 %v855_v9, %v847_v8  ;;  %v2488_v4 = vpack.c.bf16 %v921_v62, %v913_v60  ;;  %v1016_v60 = vld [vmem:[%s3418_s10 + $0x1548] sm:$0xff]  ;;  %v1018_v62 = vld [vmem:[%s3418_s10 + $0x1558] sm:$0xff] }
  0xe8   : > { %2451 = vmatprep.subr.bf16.mxu1 %v2450_v15  ;;  %v866_v15 = vld [vmem:[%s3418_s10 + $0x1098] sm:$0xff]  ;;  %v2472_v19 = vpack.c.bf16 %v857_v12, %v849_v10  ;;  %v929_v8 = vld [vmem:[%s3418_s10 + $0x1290] sm:$0xff]  ;;  %v2490_v9 = vpack.c.bf16 %v938_v2, %v930_v1  ;;  %v952_v12 = vld [vmem:[%s3418_s10 + $0x1348] sm:$0xff] }
  0xe9   : > { %v2474_v24 = vpack.c.bf16 %v874_v16, %v866_v15  ;;  %v937_v10 = vld [vmem:[%s3418_s10 + $0x12d0] sm:$0xff]  ;;  %v1007_v2 = vld [vmem:[%s3418_s10 + $0x1500] sm:$0xff] }
  0xea   : > { %2261 = vmatpush1.bf16.msra.mxu0 %v2260_v21  ;;  %v863_v21 = vld [vmem:[%s3418_s10 + $0x1080] sm:$0xff]  ;;  %v2492_v16 = vpack.c.bf16 %v937_v10, %v929_v8  ;;  %v1032_v8 = vld [vmem:[%s3418_s10 + $0x15c8] sm:$0xff]  ;;  %v1034_v10 = vld [vmem:[%s3418_s10 + $0x15d8] sm:$0xff] }
  0xeb   : > { %2453 = vmatpush1.bf16.msra.mxu1 %v2452_v22  ;;  %2263 = vmatprep.subr.bf16.mxu0 %v2262_v23  ;;  %v871_v22 = vld [vmem:[%s3418_s10 + $0x10c0] sm:$0xff]  ;;  %v865_v23 = vld [vmem:[%s3418_s10 + $0x1090] sm:$0xff] }
  0xec   : > { %2455 = vmatprep.subr.bf16.mxu1 %v2454_v27  ;;  %v888_v27 = vld [vmem:[%s3418_s10 + $0x1148] sm:$0xff]  ;;  %v2284_v31 = vpack.c.bf16 %v871_v22, %v863_v21  ;;  %v2476_v32 = vpack.c.bf16 %v873_v25, %v865_v23  ;;  %v2494_v21 = vpack.c.bf16 %v954_v14, %v946_v13  ;;  %v953_v22 = vld [vmem:[%s3418_s10 + $0x1350] sm:$0xff]  ;;  %v962_v25 = vld [vmem:[%s3418_s10 + $0x1398] sm:$0xff] }
  0xed   : > { %v960_v23 = vld [vmem:[%s3418_s10 + $0x1388] sm:$0xff]  ;;  %v1023_v14 = vld [vmem:[%s3418_s10 + $0x1580] sm:$0xff] }
  0xee   : > { %2265 = vmatpush1.bf16.msra.mxu0 %v2264_v33  ;;  %v2286_v33 = vpack.c.bf16 %v888_v27, %v880_v26  ;;  %v970_v26 = vld [vmem:[%s3418_s10 + $0x13d8] sm:$0xff] }
  0xef   : > { %2457 = vmatpush1.bf16.msra.mxu1 %v2456_v34  ;;  %2267 = vmatprep.subr.bf16.mxu0 %v2266_v35  ;;  %v879_v34 = vld [vmem:[%s3418_s10 + $0x1100] sm:$0xff] }
  0xf0   : > { %2459 = vmatprep.subr.bf16.mxu1 %v2458_v39  ;;  %v887_v35 = vld [vmem:[%s3418_s10 + $0x1140] sm:$0xff]  ;;  %v896_v39 = vld [vmem:[%s3418_s10 + $0x1188] sm:$0xff] }
  0xf1   : > { %v2288_v43 = vpack.c.bf16 %v887_v35, %v879_v34  ;;  %v969_v34 = vld [vmem:[%s3418_s10 + $0x13d0] sm:$0xff]  ;;  %v976_v35 = vld [vmem:[%s3418_s10 + $0x1408] sm:$0xff] }
  0xf2   : > { %2269 = vmatpush1.bf16.msra.mxu0 %v2268_v45  ;;  %v2290_v45 = vpack.c.bf16 %v904_v40, %v896_v39  ;;  %v2310_v41 = vpack.c.bf16 %v984_v36, %v976_v35 }
  0xf3   : > { %2461 = vmatpush1.bf16.msra.mxu1 %v2460_v46  ;;  %2271 = vmatprep.subr.bf16.mxu0 %v2270_v47  ;;  %v895_v46 = vld [vmem:[%s3418_s10 + $0x1180] sm:$0xff] }
  0xf4   : > { %2463 = vmatprep.subr.bf16.mxu1 %v2462_v51  ;;  %v903_v47 = vld [vmem:[%s3418_s10 + $0x11c0] sm:$0xff]  ;;  %v912_v51 = vld [vmem:[%s3418_s10 + $0x1208] sm:$0xff] }
  0xf5   : > { %v2292_v55 = vpack.c.bf16 %v903_v47, %v895_v46  ;;  %v985_v46 = vld [vmem:[%s3418_s10 + $0x1450] sm:$0xff]  ;;  %v992_v47 = vld [vmem:[%s3418_s10 + $0x1488] sm:$0xff] }
  0xf6   : > { %2273 = vmatpush1.bf16.msra.mxu0 %v2272_v57  ;;  %v2294_v57 = vpack.c.bf16 %v920_v52, %v912_v51  ;;  %v2314_v53 = vpack.c.bf16 %v1000_v48, %v992_v47 }
  0xf7   : > { %2465 = vmatpush1.bf16.msra.mxu1 %v2464_v58  ;;  %2275 = vmatprep.subr.bf16.mxu0 %v2274_v59  ;;  %v911_v58 = vld [vmem:[%s3418_s10 + $0x1200] sm:$0xff] }
  0xf8   : > { %2467 = vmatprep.subr.bf16.mxu1 %v2466_v63  ;;  %v919_v59 = vld [vmem:[%s3418_s10 + $0x1240] sm:$0xff]  ;;  %v928_v63 = vld [vmem:[%s3418_s10 + $0x1288] sm:$0xff] }
  0xf9   : > { %v2296_v3 = vpack.c.bf16 %v919_v59, %v911_v58  ;;  %v1001_v58 = vld [vmem:[%s3418_s10 + $0x14d0] sm:$0xff]  ;;  %v1008_v59 = vld [vmem:[%s3418_s10 + $0x1508] sm:$0xff] }
  0xfa   : > { %2277 = vmatpush1.bf16.msra.mxu0 %v2276_v5  ;;  %v2298_v5 = vpack.c.bf16 %v936_v0, %v928_v63  ;;  %v2318_v1 = vpack.c.bf16 %v1016_v60, %v1008_v59 }
  0xfb   : > { %2469 = vmatpush1.bf16.msra.mxu1 %v2468_v6  ;;  %2279 = vmatprep.subr.bf16.mxu0 %v2278_v7  ;;  %v927_v6 = vld [vmem:[%s3418_s10 + $0x1280] sm:$0xff] }
  0xfc   : > { %2471 = vmatprep.subr.bf16.mxu1 %v2470_v11  ;;  %v935_v7 = vld [vmem:[%s3418_s10 + $0x12c0] sm:$0xff]  ;;  %v944_v11 = vld [vmem:[%s3418_s10 + $0x1308] sm:$0xff] }
  0xfd   : > { %1239 = vmatmul.mubr.f32.vlgmr.msra.gmra.mrb[0].mxu0 %v331_v17  ;;  %v2300_v15 = vpack.c.bf16 %v935_v7, %v927_v6  ;;  %v1017_v6 = vld [vmem:[%s3418_s10 + $0x1550] sm:$0xff]  ;;  %v1024_v7 = vld [vmem:[%s3418_s10 + $0x1588] sm:$0xff] }
  0xfe   : > { %2281 = vmatpush1.bf16.msra.mxu0 %v2280_v18  ;;  %1452 = vmatmul.mubr.f32.vlgmr.msra.gmra.mrb[0].mxu1 %v331_v17  ;;  %v2302_v17 = vpack.c.bf16 %v952_v12, %v944_v11  ;;  %v943_v18 = vld [vmem:[%s3418_s10 + $0x1300] sm:$0xff]  ;;  %v2322_v13 = vpack.c.bf16 %v1032_v8, %v1024_v7 }
  0xff   : > { %2473 = vmatpush1.bf16.msra.mxu1 %v2472_v19  ;;  %2283 = vmatprep.subr.bf16.mxu0 %v2282_v20  ;;  %v951_v19 = vld [vmem:[%s3418_s10 + $0x1340] sm:$0xff]  ;;  %v945_v20 = vld [vmem:[%s3418_s10 + $0x1310] sm:$0xff] }
 0x100   : > { %2475 = vmatprep.subr.bf16.mxu1 %v2474_v24  ;;  %1309 = vmatprep.mubr.f32.mxu0 %v334_v30  ;;  %v968_v24 = vld [vmem:[%s3418_s10 + $0x13c8] sm:$0xff]  ;;  %v2304_v27 = vpack.c.bf16 %v951_v19, %v943_v18  ;;  %v2496_v28 = vpack.c.bf16 %v953_v22, %v945_v20  ;;  %v1033_v18 = vld [vmem:[%s3418_s10 + $0x15d0] sm:$0xff]  ;;  %v1050_v22 = vld [vmem:[%s3418_s10 + $0x1658] sm:$0xff] }
 0x101   : > { %1522 = vmatprep.mubr.f32.mxu1 %v334_v30  ;;  %v2306_v29 = vpack.c.bf16 %v968_v24, %v960_v23  ;;  %v959_v30 = vld [vmem:[%s3418_s10 + $0x1380] sm:$0xff]  ;;  %v1040_v19 = vld [vmem:[%s3418_s10 + $0x1608] sm:$0xff] }
 0x102   : > { %2285 = vmatpush1.bf16.msra.mxu0 %v2284_v31  ;;  %v967_v31 = vld [vmem:[%s3418_s10 + $0x13c0] sm:$0xff]  ;;  %v1048_v20 = vld [vmem:[%s3418_s10 + $0x1648] sm:$0xff] }
 0x103   : > { %2477 = vmatpush1.bf16.msra.mxu1 %v2476_v32  ;;  %2287 = vmatprep.subr.bf16.mxu0 %v2286_v33  ;;  %v961_v32 = vld [vmem:[%s3418_s10 + $0x1390] sm:$0xff]  ;;  %v2498_v33 = vpack.c.bf16 %v970_v26, %v962_v25  ;;  %v2308_v39 = vpack.c.bf16 %v967_v31, %v959_v30  ;;  %v2326_v25 = vpack.c.bf16 %v1048_v20, %v1040_v19  ;;  %v1039_v26 = vld [vmem:[%s3418_s10 + $0x1600] sm:$0xff]  ;;  %v1056_v31 = vld [vmem:[%s3418_s10 + $0x1688] sm:$0xff] }
 0x104   : > { %2479 = vmatprep.subr.bf16.mxu1 %v2478_v37  ;;  %v978_v37 = vld [vmem:[%s3418_s10 + $0x1418] sm:$0xff]  ;;  %v2500_v40 = vpack.c.bf16 %v969_v34, %v961_v32  ;;  %v1049_v30 = vld [vmem:[%s3418_s10 + $0x1650] sm:$0xff]  ;;  %v1064_v32 = vld [vmem:[%s3418_s10 + $0x16c8] sm:$0xff] }
 0x105   : > { %v1066_v34 = vld [vmem:[%s3418_s10 + $0x16d8] sm:$0xff]  ;;  %v333_v19 = vld [vmem:[#allocation2 + $0x20] sm:$0xff] }
 0x106   : > { %2289 = vmatpush1.bf16.msra.mxu0 %v2288_v43  ;;  %v983_v43 = vld [vmem:[%s3418_s10 + $0x1440] sm:$0xff] }
 0x107   : > { %2481 = vmatpush1.bf16.msra.mxu1 %v2480_v44  ;;  %2291 = vmatprep.subr.bf16.mxu0 %v2290_v45  ;;  %v977_v44 = vld [vmem:[%s3418_s10 + $0x1410] sm:$0xff]  ;;  %v2502_v45 = vpack.c.bf16 %v986_v38, %v978_v37  ;;  %v2312_v51 = vpack.c.bf16 %v983_v43, %v975_v42  ;;  %v2330_v37 = vpack.c.bf16 %v1064_v32, %v1056_v31  ;;  %v1055_v38 = vld [vmem:[%s3418_s10 + $0x1680] sm:$0xff]  ;;  %v1072_v43 = vld [vmem:[%s3418_s10 + $0x1708] sm:$0xff] }
 0x108   : > { %2483 = vmatprep.subr.bf16.mxu1 %v2482_v49  ;;  %v994_v49 = vld [vmem:[%s3418_s10 + $0x1498] sm:$0xff]  ;;  %v2504_v52 = vpack.c.bf16 %v985_v46, %v977_v44  ;;  %v1065_v42 = vld [vmem:[%s3418_s10 + $0x16d0] sm:$0xff]  ;;  %v1080_v44 = vld [vmem:[%s3418_s10 + $0x1748] sm:$0xff] }
 0x109   : > { %v1082_v46 = vld [vmem:[%s3418_s10 + $0x1758] sm:$0xff] }
 0x10a   : > { %2293 = vmatpush1.bf16.msra.mxu0 %v2292_v55  ;;  %v999_v55 = vld [vmem:[%s3418_s10 + $0x14c0] sm:$0xff]  ;;  %v382_v31 = vld [vmem:[%s3418_s10 + $0x178] sm:$0xff] }
 0x10b   : > { %2485 = vmatpush1.bf16.msra.mxu1 %v2484_v56  ;;  %2295 = vmatprep.subr.bf16.mxu0 %v2294_v57  ;;  %v993_v56 = vld [vmem:[%s3418_s10 + $0x1490] sm:$0xff]  ;;  %v2506_v57 = vpack.c.bf16 %v1002_v50, %v994_v49  ;;  %v2316_v63 = vpack.c.bf16 %v999_v55, %v991_v54  ;;  %v2334_v49 = vpack.c.bf16 %v1080_v44, %v1072_v43  ;;  %v1071_v50 = vld [vmem:[%s3418_s10 + $0x1700] sm:$0xff]  ;;  %v1088_v55 = vld [vmem:[%s3418_s10 + $0x1788] sm:$0xff] }
 0x10c   : > { %2487 = vmatprep.subr.bf16.mxu1 %v2486_v61  ;;  %v1010_v61 = vld [vmem:[%s3418_s10 + $0x1518] sm:$0xff]  ;;  %v2508_v0 = vpack.c.bf16 %v1001_v58, %v993_v56  ;;  %v1081_v54 = vld [vmem:[%s3418_s10 + $0x1750] sm:$0xff]  ;;  %v1096_v56 = vld [vmem:[%s3418_s10 + $0x17c8] sm:$0xff] }
 0x10d   : > { %v1098_v58 = vld [vmem:[%s3418_s10 + $0x17d8] sm:$0xff] }
 0x10e   : > { %2297 = vmatpush1.bf16.msra.mxu0 %v2296_v3  ;;  %v1015_v3 = vld [vmem:[%s3418_s10 + $0x1540] sm:$0xff]  ;;  %v390_v43 = vld [vmem:[%s3418_s10 + $0x1b8] sm:$0xff] }
 0x10f   : > { %2489 = vmatpush1.bf16.msra.mxu1 %v2488_v4  ;;  %2299 = vmatprep.subr.bf16.mxu0 %v2298_v5  ;;  %v1009_v4 = vld [vmem:[%s3418_s10 + $0x1510] sm:$0xff]  ;;  %v2510_v5 = vpack.c.bf16 %v1018_v62, %v1010_v61  ;;  %v2320_v11 = vpack.c.bf16 %v1015_v3, %v1007_v2  ;;  %v2338_v61 = vpack.c.bf16 %v1096_v56, %v1088_v55  ;;  %v1087_v62 = vld [vmem:[%s3418_s10 + $0x1780] sm:$0xff]  ;;  %v340_v3 = vld [vmem:[%s3418_s10 + $0x28] sm:$0xff] }
 0x110   : > { %2491 = vmatprep.subr.bf16.mxu1 %v2490_v9  ;;  %v1026_v9 = vld [vmem:[%s3418_s10 + $0x1598] sm:$0xff]  ;;  %v2512_v12 = vpack.c.bf16 %v1017_v6, %v1009_v4  ;;  %v1097_v2 = vld [vmem:[%s3418_s10 + $0x17d0] sm:$0xff]  ;;  %v348_v4 = vld [vmem:[%s3418_s10 + $0x68] sm:$0xff] }
 0x111   : > { %v350_v6 = vld [vmem:[%s3418_s10 + $0x78] sm:$0xff] }
 0x112   : > { %2301 = vmatpush1.bf16.msra.mxu0 %v2300_v15  ;;  %v1031_v15 = vld [vmem:[%s3418_s10 + $0x15c0] sm:$0xff]  ;;  %v398_v44 = vld [vmem:[%s3418_s10 + $0x1f8] sm:$0xff] }
 0x113   : > { %2493 = vmatpush1.bf16.msra.mxu1 %v2492_v16  ;;  %2303 = vmatprep.subr.bf16.mxu0 %v2302_v17  ;;  %v1025_v16 = vld [vmem:[%s3418_s10 + $0x1590] sm:$0xff]  ;;  %v2514_v17 = vpack.c.bf16 %v1034_v10, %v1026_v9  ;;  %v2324_v23 = vpack.c.bf16 %v1031_v15, %v1023_v14  ;;  %v2534_v9 = vpack.c.bf16 %v348_v4, %v340_v3  ;;  %v339_v10 = vld [vmem:[%s3418_s10 + $0x20] sm:$0xff]  ;;  %v356_v15 = vld [vmem:[%s3418_s10 + $0xa8] sm:$0xff] }
 0x114   : > { %2495 = vmatprep.subr.bf16.mxu1 %v2494_v21  ;;  %v1042_v21 = vld [vmem:[%s3418_s10 + $0x1618] sm:$0xff]  ;;  %v2516_v24 = vpack.c.bf16 %v1033_v18, %v1025_v16  ;;  %v349_v14 = vld [vmem:[%s3418_s10 + $0x70] sm:$0xff]  ;;  %v364_v16 = vld [vmem:[%s3418_s10 + $0xe8] sm:$0xff] }
 0x115   : > { %v366_v18 = vld [vmem:[%s3418_s10 + $0xf8] sm:$0xff] }
 0x116   : > { %2305 = vmatpush1.bf16.msra.mxu0 %v2304_v27  ;;  %v1047_v27 = vld [vmem:[%s3418_s10 + $0x1640] sm:$0xff]  ;;  %v406_v55 = vld [vmem:[%s3418_s10 + $0x238] sm:$0xff] }
 0x117   : > { %2497 = vmatpush1.bf16.msra.mxu1 %v2496_v28  ;;  %2307 = vmatprep.subr.bf16.mxu0 %v2306_v29  ;;  %v1041_v28 = vld [vmem:[%s3418_s10 + $0x1610] sm:$0xff]  ;;  %v2518_v29 = vpack.c.bf16 %v1050_v22, %v1042_v21  ;;  %v2328_v35 = vpack.c.bf16 %v1047_v27, %v1039_v26  ;;  %v2538_v22 = vpack.c.bf16 %v364_v16, %v356_v15  ;;  %v414_v56 = vld [vmem:[%s3418_s10 + $0x278] sm:$0xff] }
 0x118   : > { %2499 = vmatprep.subr.bf16.mxu1 %v2498_v33  ;;  %v1058_v33 = vld [vmem:[%s3418_s10 + $0x1698] sm:$0xff]  ;;  %v2520_v36 = vpack.c.bf16 %v1049_v30, %v1041_v28  ;;  %v365_v27 = vld [vmem:[%s3418_s10 + $0xf0] sm:$0xff]  ;;  %v372_v28 = vld [vmem:[%s3418_s10 + $0x128] sm:$0xff] }
 0x119   : > { %v374_v30 = vld [vmem:[%s3418_s10 + $0x138] sm:$0xff] }
 0x11a   : > { %2309 = vmatpush1.bf16.msra.mxu0 %v2308_v39  ;;  %v1063_v39 = vld [vmem:[%s3418_s10 + $0x16c0] sm:$0xff]  ;;  %v422_v3 = vld [vmem:[%s3418_s10 + $0x2b8] sm:$0xff] }
 0x11b   : > { %2501 = vmatpush1.bf16.msra.mxu1 %v2500_v40  ;;  %2311 = vmatprep.subr.bf16.mxu0 %v2310_v41  ;;  %v1057_v40 = vld [vmem:[%s3418_s10 + $0x1690] sm:$0xff]  ;;  %v2522_v41 = vpack.c.bf16 %v1066_v34, %v1058_v33  ;;  %v2332_v47 = vpack.c.bf16 %v1063_v39, %v1055_v38  ;;  %v2734_v38 = vpack.c.bf16 %v382_v31, %v374_v30  ;;  %v430_v4 = vld [vmem:[%s3418_s10 + $0x2f8] sm:$0xff] }
 0x11c   : > { %2503 = vmatprep.subr.bf16.mxu1 %v2502_v45  ;;  %v1074_v45 = vld [vmem:[%s3418_s10 + $0x1718] sm:$0xff]  ;;  %v2524_v48 = vpack.c.bf16 %v1065_v42, %v1057_v40  ;;  %v381_v39 = vld [vmem:[%s3418_s10 + $0x170] sm:$0xff]  ;;  %v388_v40 = vld [vmem:[%s3418_s10 + $0x1a8] sm:$0xff] }
 0x11d   : > { %v3017_v42 = vld [vmem:[#allocation2 + $0x8] sm:$0xff] }
 0x11e   : > { %2313 = vmatpush1.bf16.msra.mxu0 %v2312_v51  ;;  %v1079_v51 = vld [vmem:[%s3418_s10 + $0x1740] sm:$0xff]  ;;  %v438_v15 = vld [vmem:[%s3418_s10 + $0x338] sm:$0xff] }
 0x11f   : > { %2505 = vmatpush1.bf16.msra.mxu1 %v2504_v52  ;;  %2315 = vmatprep.subr.bf16.mxu0 %v2314_v53  ;;  %v1073_v52 = vld [vmem:[%s3418_s10 + $0x1710] sm:$0xff]  ;;  %v2526_v53 = vpack.c.bf16 %v1082_v46, %v1074_v45  ;;  %v2336_v59 = vpack.c.bf16 %v1079_v51, %v1071_v50  ;;  %v2738_v51 = vpack.c.bf16 %v398_v44, %v390_v43  ;;  %v446_v16 = vld [vmem:[%s3418_s10 + $0x378] sm:$0xff]  ;;  %v467_v44 = vld [vmem:[%s3418_s10 + $0x420] sm:$0xff] }
 0x120   : > { %2507 = vmatprep.subr.bf16.mxu1 %v2506_v57  ;;  %v1090_v57 = vld [vmem:[%s3418_s10 + $0x1798] sm:$0xff]  ;;  %v2528_v60 = vpack.c.bf16 %v1081_v54, %v1073_v52  ;;  %v389_v50 = vld [vmem:[%s3418_s10 + $0x1b0] sm:$0xff]  ;;  %v412_v54 = vld [vmem:[%s3418_s10 + $0x268] sm:$0xff] }
 0x121   : > { %v397_v52 = vld [vmem:[%s3418_s10 + $0x1f0] sm:$0xff] }
 0x122   : > { %2317 = vmatpush1.bf16.msra.mxu0 %v2316_v63  ;;  %v1095_v63 = vld [vmem:[%s3418_s10 + $0x17c0] sm:$0xff] }
 0x123   : > { %2509 = vmatpush1.bf16.msra.mxu1 %v2508_v0  ;;  %2319 = vmatprep.subr.bf16.mxu0 %v2318_v1  ;;  %v1089_v0 = vld [vmem:[%s3418_s10 + $0x1790] sm:$0xff]  ;;  %v2530_v1 = vpack.c.bf16 %v1098_v58, %v1090_v57  ;;  %v2340_v7 = vpack.c.bf16 %v1095_v63, %v1087_v62  ;;  %v2740_v58 = vpack.c.bf16 %v397_v52, %v389_v50  ;;  %v492_v50 = vld [vmem:[%s3418_s10 + $0x4e8] sm:$0xff]  ;;  %v494_v52 = vld [vmem:[%s3418_s10 + $0x4f8] sm:$0xff] }
 0x124   : > { %2511 = vmatprep.subr.bf16.mxu1 %v2510_v5  ;;  %v342_v5 = vld [vmem:[%s3418_s10 + $0x38] sm:$0xff]  ;;  %v2532_v8 = vpack.c.bf16 %v1097_v2, %v1089_v0  ;;  %v405_v62 = vld [vmem:[%s3418_s10 + $0x230] sm:$0xff]  ;;  %v2742_v63 = vpack.c.bf16 %v414_v56, %v406_v55  ;;  %v428_v2 = vld [vmem:[%s3418_s10 + $0x2e8] sm:$0xff] }
 0x125   : > { %v413_v0 = vld [vmem:[%s3418_s10 + $0x270] sm:$0xff]  ;;  %v483_v56 = vld [vmem:[%s3418_s10 + $0x4a0] sm:$0xff] }
 0x126   : > { %2321 = vmatpush1.bf16.msra.mxu0 %v2320_v11  ;;  %v347_v11 = vld [vmem:[%s3418_s10 + $0x60] sm:$0xff] }
 0x127   : > { %2513 = vmatpush1.bf16.msra.mxu1 %v2512_v12  ;;  %2323 = vmatprep.subr.bf16.mxu0 %v2322_v13  ;;  %v341_v12 = vld [vmem:[%s3418_s10 + $0x30] sm:$0xff]  ;;  %v2726_v13 = vpack.c.bf16 %v350_v6, %v342_v5  ;;  %v2536_v20 = vpack.c.bf16 %v347_v11, %v339_v10  ;;  %v2744_v6 = vpack.c.bf16 %v413_v0, %v405_v62  ;;  %v508_v62 = vld [vmem:[%s3418_s10 + $0x568] sm:$0xff]  ;;  %v510_v0 = vld [vmem:[%s3418_s10 + $0x578] sm:$0xff] }
 0x128   : > { %2515 = vmatprep.subr.bf16.mxu1 %v2514_v17  ;;  %v358_v17 = vld [vmem:[%s3418_s10 + $0xb8] sm:$0xff]  ;;  %v2728_v21 = vpack.c.bf16 %v349_v14, %v341_v12  ;;  %v421_v10 = vld [vmem:[%s3418_s10 + $0x2b0] sm:$0xff]  ;;  %v2746_v11 = vpack.c.bf16 %v430_v4, %v422_v3  ;;  %v444_v14 = vld [vmem:[%s3418_s10 + $0x368] sm:$0xff] }
 0x129   : > { %v2730_v26 = vpack.c.bf16 %v366_v18, %v358_v17  ;;  %v429_v12 = vld [vmem:[%s3418_s10 + $0x2f0] sm:$0xff]  ;;  %v499_v4 = vld [vmem:[%s3418_s10 + $0x520] sm:$0xff] }
 0x12a   : > { %2325 = vmatpush1.bf16.msra.mxu0 %v2324_v23  ;;  %v355_v23 = vld [vmem:[%s3418_s10 + $0xa0] sm:$0xff]  ;;  %v2748_v18 = vpack.c.bf16 %v429_v12, %v421_v10  ;;  %v524_v10 = vld [vmem:[%s3418_s10 + $0x5e8] sm:$0xff]  ;;  %v526_v12 = vld [vmem:[%s3418_s10 + $0x5f8] sm:$0xff] }
 0x12b   : > { %2517 = vmatpush1.bf16.msra.mxu1 %v2516_v24  ;;  %2327 = vmatprep.subr.bf16.mxu0 %v2326_v25  ;;  %v363_v24 = vld [vmem:[%s3418_s10 + $0xe0] sm:$0xff]  ;;  %v357_v25 = vld [vmem:[%s3418_s10 + $0xb0] sm:$0xff] }
 0x12c   : > { %2519 = vmatprep.subr.bf16.mxu1 %v2518_v29  ;;  %v380_v29 = vld [vmem:[%s3418_s10 + $0x168] sm:$0xff]  ;;  %v2540_v32 = vpack.c.bf16 %v363_v24, %v355_v23  ;;  %v2732_v33 = vpack.c.bf16 %v365_v27, %v357_v25  ;;  %v2750_v23 = vpack.c.bf16 %v446_v16, %v438_v15  ;;  %v445_v24 = vld [vmem:[%s3418_s10 + $0x370] sm:$0xff]  ;;  %v454_v27 = vld [vmem:[%s3418_s10 + $0x3b8] sm:$0xff] }
 0x12d   : > { %v2542_v34 = vpack.c.bf16 %v380_v29, %v372_v28  ;;  %v452_v25 = vld [vmem:[%s3418_s10 + $0x3a8] sm:$0xff]  ;;  %v462_v28 = vld [vmem:[%s3418_s10 + $0x3f8] sm:$0xff]  ;;  %v515_v16 = vld [vmem:[%s3418_s10 + $0x5a0] sm:$0xff] }
 0x12e   : > { %2329 = vmatpush1.bf16.msra.mxu0 %v2328_v35  ;;  %v371_v35 = vld [vmem:[%s3418_s10 + $0x120] sm:$0xff] }
 0x12f   : > { %2521 = vmatpush1.bf16.msra.mxu1 %v2520_v36  ;;  %2331 = vmatprep.subr.bf16.mxu0 %v2330_v37  ;;  %v379_v36 = vld [vmem:[%s3418_s10 + $0x160] sm:$0xff]  ;;  %v373_v37 = vld [vmem:[%s3418_s10 + $0x130] sm:$0xff] }
 0x130   : > { %2523 = vmatprep.subr.bf16.mxu1 %v2522_v41  ;;  %v396_v41 = vld [vmem:[%s3418_s10 + $0x1e8] sm:$0xff]  ;;  %v2544_v45 = vpack.c.bf16 %v379_v36, %v371_v35  ;;  %v2736_v46 = vpack.c.bf16 %v381_v39, %v373_v37  ;;  %v2754_v35 = vpack.c.bf16 %v462_v28, %v454_v27  ;;  %v461_v36 = vld [vmem:[%s3418_s10 + $0x3f0] sm:$0xff]  ;;  %v470_v39 = vld [vmem:[%s3418_s10 + $0x438] sm:$0xff] }
 0x131   : > { %v468_v37 = vld [vmem:[%s3418_s10 + $0x428] sm:$0xff]  ;;  %v531_v28 = vld [vmem:[%s3418_s10 + $0x620] sm:$0xff] }
 0x132   : > { %2333 = vmatpush1.bf16.msra.mxu0 %v2332_v47  ;;  %v2546_v47 = vpack.c.bf16 %v396_v41, %v388_v40  ;;  %v478_v40 = vld [vmem:[%s3418_s10 + $0x478] sm:$0xff] }
 0x133   : > { %2525 = vmatpush1.bf16.msra.mxu1 %v2524_v48  ;;  %2335 = vmatprep.subr.bf16.mxu0 %v2334_v49  ;;  %v387_v48 = vld [vmem:[%s3418_s10 + $0x1a0] sm:$0xff] }
 0x134   : > { %2527 = vmatprep.subr.bf16.mxu1 %v2526_v53  ;;  %v395_v49 = vld [vmem:[%s3418_s10 + $0x1e0] sm:$0xff]  ;;  %v404_v53 = vld [vmem:[%s3418_s10 + $0x228] sm:$0xff] }
 0x135   : > { %v2548_v57 = vpack.c.bf16 %v395_v49, %v387_v48  ;;  %v477_v48 = vld [vmem:[%s3418_s10 + $0x470] sm:$0xff]  ;;  %v484_v49 = vld [vmem:[%s3418_s10 + $0x4a8] sm:$0xff] }
 0x136   : > { %2337 = vmatpush1.bf16.msra.mxu0 %v2336_v59  ;;  %v2550_v59 = vpack.c.bf16 %v412_v54, %v404_v53  ;;  %v2570_v55 = vpack.c.bf16 %v492_v50, %v484_v49 }
 0x137   : > { %2529 = vmatpush1.bf16.msra.mxu1 %v2528_v60  ;;  %2339 = vmatprep.subr.bf16.mxu0 %v2338_v61  ;;  %v403_v60 = vld [vmem:[%s3418_s10 + $0x220] sm:$0xff] }
 0x138   : > { %2531 = vmatprep.subr.bf16.mxu1 %v2530_v1  ;;  %v411_v61 = vld [vmem:[%s3418_s10 + $0x260] sm:$0xff]  ;;  %v420_v1 = vld [vmem:[%s3418_s10 + $0x2a8] sm:$0xff] }
 0x139   : > { %v2552_v5 = vpack.c.bf16 %v411_v61, %v403_v60  ;;  %v493_v60 = vld [vmem:[%s3418_s10 + $0x4f0] sm:$0xff]  ;;  %v500_v61 = vld [vmem:[%s3418_s10 + $0x528] sm:$0xff] }
 0x13a   : > { %2341 = vmatpush1.bf16.msra.mxu0 %v2340_v7  ;;  %v2554_v7 = vpack.c.bf16 %v428_v2, %v420_v1  ;;  %v2574_v3 = vpack.c.bf16 %v508_v62, %v500_v61 }
 0x13b   : > { %2533 = vmatpush1.bf16.msra.mxu1 %v2532_v8  ;;  %2535 = vmatprep.subr.bf16.mxu0 %v2534_v9  ;;  %v419_v8 = vld [vmem:[%s3418_s10 + $0x2a0] sm:$0xff] }
 0x13c   : > { %2727 = vmatprep.subr.bf16.mxu1 %v2726_v13  ;;  %v427_v9 = vld [vmem:[%s3418_s10 + $0x2e0] sm:$0xff]  ;;  %v436_v13 = vld [vmem:[%s3418_s10 + $0x328] sm:$0xff] }
 0x13d   : > { %1310 = vmatmul.mubr.f32.vlgmr.msra.gmra.mrb[0].mxu0 %v333_v19  ;;  %v2556_v17 = vpack.c.bf16 %v427_v9, %v419_v8  ;;  %v509_v8 = vld [vmem:[%s3418_s10 + $0x570] sm:$0xff]  ;;  %v516_v9 = vld [vmem:[%s3418_s10 + $0x5a8] sm:$0xff] }
 0x13e   : > { %1523 = vmatmul.mubr.f32.vlgmr.msra.gmra.mrb[0].mxu1 %v333_v19  ;;  %2537 = vmatpush1.bf16.msra.mxu0 %v2536_v20  ;;  %v2558_v19 = vpack.c.bf16 %v444_v14, %v436_v13  ;;  %v435_v20 = vld [vmem:[%s3418_s10 + $0x320] sm:$0xff]  ;;  %v2578_v15 = vpack.c.bf16 %v524_v10, %v516_v9 }
 0x13f   : > { %2729 = vmatpush1.bf16.msra.mxu1 %v2728_v21  ;;  %2539 = vmatprep.subr.bf16.mxu0 %v2538_v22  ;;  %v443_v21 = vld [vmem:[%s3418_s10 + $0x360] sm:$0xff]  ;;  %v437_v22 = vld [vmem:[%s3418_s10 + $0x330] sm:$0xff] }
 0x140   : > { %2731 = vmatprep.subr.bf16.mxu1 %v2730_v26  ;;  %1593 = vmatprep.mubr.f32.mxu0 %v3017_v42  ;;  %v460_v26 = vld [vmem:[%s3418_s10 + $0x3e8] sm:$0xff]  ;;  %v2560_v29 = vpack.c.bf16 %v443_v21, %v435_v20  ;;  %v2752_v30 = vpack.c.bf16 %v445_v24, %v437_v22  ;;  %v525_v20 = vld [vmem:[%s3418_s10 + $0x5f0] sm:$0xff]  ;;  %v542_v24 = vld [vmem:[%s3418_s10 + $0x678] sm:$0xff] }
 0x141   : > { %1806 = vmatprep.mubr.f32.mxu1 %v3017_v42  ;;  %v2562_v31 = vpack.c.bf16 %v460_v26, %v452_v25  ;;  %v532_v21 = vld [vmem:[%s3418_s10 + $0x628] sm:$0xff] }
 0x142   : > { %2541 = vmatpush1.bf16.msra.mxu0 %v2540_v32  ;;  %v451_v32 = vld [vmem:[%s3418_s10 + $0x3a0] sm:$0xff]  ;;  %v540_v22 = vld [vmem:[%s3418_s10 + $0x668] sm:$0xff] }
 0x143   : > { %2733 = vmatpush1.bf16.msra.mxu1 %v2732_v33  ;;  %2543 = vmatprep.subr.bf16.mxu0 %v2542_v34  ;;  %v459_v33 = vld [vmem:[%s3418_s10 + $0x3e0] sm:$0xff]  ;;  %v453_v34 = vld [vmem:[%s3418_s10 + $0x3b0] sm:$0xff]  ;;  %v2582_v27 = vpack.c.bf16 %v540_v22, %v532_v21 }
 0x144   : > { %2735 = vmatprep.subr.bf16.mxu1 %v2734_v38  ;;  %v476_v38 = vld [vmem:[%s3418_s10 + $0x468] sm:$0xff]  ;;  %v2564_v41 = vpack.c.bf16 %v459_v33, %v451_v32  ;;  %v2756_v42 = vpack.c.bf16 %v461_v36, %v453_v34  ;;  %v541_v32 = vld [vmem:[%s3418_s10 + $0x670] sm:$0xff]  ;;  %v558_v36 = vld [vmem:[%s3418_s10 + $0x6f8] sm:$0xff] }
 0x145   : > { %v2566_v43 = vpack.c.bf16 %v476_v38, %v468_v37  ;;  %v548_v33 = vld [vmem:[%s3418_s10 + $0x6a8] sm:$0xff] }
 0x146   : > { %2545 = vmatpush1.bf16.msra.mxu0 %v2544_v45  ;;  %v475_v45 = vld [vmem:[%s3418_s10 + $0x460] sm:$0xff]  ;;  %v556_v34 = vld [vmem:[%s3418_s10 + $0x6e8] sm:$0xff] }
 0x147   : > { %2737 = vmatpush1.bf16.msra.mxu1 %v2736_v46  ;;  %2547 = vmatprep.subr.bf16.mxu0 %v2546_v47  ;;  %v469_v46 = vld [vmem:[%s3418_s10 + $0x430] sm:$0xff]  ;;  %v2758_v47 = vpack.c.bf16 %v478_v40, %v470_v39  ;;  %v2568_v53 = vpack.c.bf16 %v475_v45, %v467_v44  ;;  %v2586_v39 = vpack.c.bf16 %v556_v34, %v548_v33  ;;  %v547_v40 = vld [vmem:[%s3418_s10 + $0x6a0] sm:$0xff]  ;;  %v564_v45 = vld [vmem:[%s3418_s10 + $0x728] sm:$0xff] }
 0x148   : > { %2739 = vmatprep.subr.bf16.mxu1 %v2738_v51  ;;  %v486_v51 = vld [vmem:[%s3418_s10 + $0x4b8] sm:$0xff]  ;;  %v2760_v54 = vpack.c.bf16 %v477_v48, %v469_v46  ;;  %v557_v44 = vld [vmem:[%s3418_s10 + $0x6f0] sm:$0xff]  ;;  %v572_v46 = vld [vmem:[%s3418_s10 + $0x768] sm:$0xff] }
 0x149   : > { %v574_v48 = vld [vmem:[%s3418_s10 + $0x778] sm:$0xff] }
 0x14a   : > { %2549 = vmatpush1.bf16.msra.mxu0 %v2548_v57  ;;  %v491_v57 = vld [vmem:[%s3418_s10 + $0x4e0] sm:$0xff]  ;;  %v638_v33 = vld [vmem:[%s3418_s10 + $0x978] sm:$0xff] }
 0x14b   : > { %2741 = vmatpush1.bf16.msra.mxu1 %v2740_v58  ;;  %2551 = vmatprep.subr.bf16.mxu0 %v2550_v59  ;;  %v485_v58 = vld [vmem:[%s3418_s10 + $0x4b0] sm:$0xff]  ;;  %v2762_v59 = vpack.c.bf16 %v494_v52, %v486_v51  ;;  %v2572_v1 = vpack.c.bf16 %v491_v57, %v483_v56  ;;  %v2590_v51 = vpack.c.bf16 %v572_v46, %v564_v45  ;;  %v563_v52 = vld [vmem:[%s3418_s10 + $0x720] sm:$0xff]  ;;  %v580_v57 = vld [vmem:[%s3418_s10 + $0x7a8] sm:$0xff] }
 0x14c   : > { %2743 = vmatprep.subr.bf16.mxu1 %v2742_v63  ;;  %v502_v63 = vld [vmem:[%s3418_s10 + $0x538] sm:$0xff]  ;;  %v2764_v2 = vpack.c.bf16 %v493_v60, %v485_v58  ;;  %v573_v56 = vld [vmem:[%s3418_s10 + $0x770] sm:$0xff]  ;;  %v588_v58 = vld [vmem:[%s3418_s10 + $0x7e8] sm:$0xff] }
 0x14d   : > { %v590_v60 = vld [vmem:[%s3418_s10 + $0x7f8] sm:$0xff] }
 0x14e   : > { %2553 = vmatpush1.bf16.msra.mxu0 %v2552_v5  ;;  %v507_v5 = vld [vmem:[%s3418_s10 + $0x560] sm:$0xff]  ;;  %v646_v45 = vld [vmem:[%s3418_s10 + $0x9b8] sm:$0xff] }
 0x14f   : > { %2745 = vmatpush1.bf16.msra.mxu1 %v2744_v6  ;;  %2555 = vmatprep.subr.bf16.mxu0 %v2554_v7  ;;  %v501_v6 = vld [vmem:[%s3418_s10 + $0x530] sm:$0xff]  ;;  %v2766_v7 = vpack.c.bf16 %v510_v0, %v502_v63  ;;  %v2576_v13 = vpack.c.bf16 %v507_v5, %v499_v4  ;;  %v2594_v63 = vpack.c.bf16 %v588_v58, %v580_v57  ;;  %v579_v0 = vld [vmem:[%s3418_s10 + $0x7a0] sm:$0xff]  ;;  %v596_v5 = vld [vmem:[%s3418_s10 + $0x828] sm:$0xff] }
 0x150   : > { %2747 = vmatprep.subr.bf16.mxu1 %v2746_v11  ;;  %v518_v11 = vld [vmem:[%s3418_s10 + $0x5b8] sm:$0xff]  ;;  %v2768_v14 = vpack.c.bf16 %v509_v8, %v501_v6  ;;  %v589_v4 = vld [vmem:[%s3418_s10 + $0x7f0] sm:$0xff]  ;;  %v604_v6 = vld [vmem:[%s3418_s10 + $0x868] sm:$0xff] }
 0x151   : > { %v606_v8 = vld [vmem:[%s3418_s10 + $0x878] sm:$0xff] }
 0x152   : > { %2557 = vmatpush1.bf16.msra.mxu0 %v2556_v17  ;;  %v523_v17 = vld [vmem:[%s3418_s10 + $0x5e0] sm:$0xff]  ;;  %v654_v46 = vld [vmem:[%s3418_s10 + $0x9f8] sm:$0xff] }
 0x153   : > { %2749 = vmatpush1.bf16.msra.mxu1 %v2748_v18  ;;  %2559 = vmatprep.subr.bf16.mxu0 %v2558_v19  ;;  %v517_v18 = vld [vmem:[%s3418_s10 + $0x5b0] sm:$0xff]  ;;  %v2770_v19 = vpack.c.bf16 %v526_v12, %v518_v11  ;;  %v2580_v25 = vpack.c.bf16 %v523_v17, %v515_v16  ;;  %v2598_v11 = vpack.c.bf16 %v604_v6, %v596_v5  ;;  %v595_v12 = vld [vmem:[%s3418_s10 + $0x820] sm:$0xff]  ;;  %v612_v17 = vld [vmem:[%s3418_s10 + $0x8a8] sm:$0xff] }
 0x154   : > { %2751 = vmatprep.subr.bf16.mxu1 %v2750_v23  ;;  %v534_v23 = vld [vmem:[%s3418_s10 + $0x638] sm:$0xff]  ;;  %v2772_v26 = vpack.c.bf16 %v525_v20, %v517_v18  ;;  %v605_v16 = vld [vmem:[%s3418_s10 + $0x870] sm:$0xff]  ;;  %v620_v18 = vld [vmem:[%s3418_s10 + $0x8e8] sm:$0xff] }
 0x155   : > { %v622_v20 = vld [vmem:[%s3418_s10 + $0x8f8] sm:$0xff] }
 0x156   : > { %2561 = vmatpush1.bf16.msra.mxu0 %v2560_v29  ;;  %v539_v29 = vld [vmem:[%s3418_s10 + $0x660] sm:$0xff]  ;;  %v662_v57 = vld [vmem:[%s3418_s10 + $0xa38] sm:$0xff] }
 0x157   : > { %2753 = vmatpush1.bf16.msra.mxu1 %v2752_v30  ;;  %2563 = vmatprep.subr.bf16.mxu0 %v2562_v31  ;;  %v533_v30 = vld [vmem:[%s3418_s10 + $0x630] sm:$0xff]  ;;  %v2774_v31 = vpack.c.bf16 %v542_v24, %v534_v23  ;;  %v2584_v37 = vpack.c.bf16 %v539_v29, %v531_v28  ;;  %v2602_v23 = vpack.c.bf16 %v620_v18, %v612_v17  ;;  %v611_v24 = vld [vmem:[%s3418_s10 + $0x8a0] sm:$0xff]  ;;  %v628_v29 = vld [vmem:[%s3418_s10 + $0x928] sm:$0xff] }
 0x158   : > { %2755 = vmatprep.subr.bf16.mxu1 %v2754_v35  ;;  %v550_v35 = vld [vmem:[%s3418_s10 + $0x6b8] sm:$0xff]  ;;  %v2776_v38 = vpack.c.bf16 %v541_v32, %v533_v30  ;;  %v621_v28 = vld [vmem:[%s3418_s10 + $0x8f0] sm:$0xff]  ;;  %v636_v30 = vld [vmem:[%s3418_s10 + $0x968] sm:$0xff] }
 0x159   : > { %v630_v32 = vld [vmem:[%s3418_s10 + $0x938] sm:$0xff] }
 0x15a   : > { %2565 = vmatpush1.bf16.msra.mxu0 %v2564_v41  ;;  %v555_v41 = vld [vmem:[%s3418_s10 + $0x6e0] sm:$0xff]  ;;  %v670_v58 = vld [vmem:[%s3418_s10 + $0xa78] sm:$0xff] }
 0x15b   : > { %2757 = vmatpush1.bf16.msra.mxu1 %v2756_v42  ;;  %2567 = vmatprep.subr.bf16.mxu0 %v2566_v43  ;;  %v549_v42 = vld [vmem:[%s3418_s10 + $0x6b0] sm:$0xff]  ;;  %v2778_v43 = vpack.c.bf16 %v558_v36, %v550_v35  ;;  %v2588_v49 = vpack.c.bf16 %v555_v41, %v547_v40  ;;  %v2606_v36 = vpack.c.bf16 %v636_v30, %v628_v29  ;;  %v678_v5 = vld [vmem:[%s3418_s10 + $0xab8] sm:$0xff] }
 0x15c   : > { %2759 = vmatprep.subr.bf16.mxu1 %v2758_v47  ;;  %v566_v47 = vld [vmem:[%s3418_s10 + $0x738] sm:$0xff]  ;;  %v2780_v50 = vpack.c.bf16 %v557_v44, %v549_v42  ;;  %v2798_v40 = vpack.c.bf16 %v638_v33, %v630_v32  ;;  %v637_v41 = vld [vmem:[%s3418_s10 + $0x970] sm:$0xff]  ;;  %v644_v42 = vld [vmem:[%s3418_s10 + $0x9a8] sm:$0xff] }
 0x15d   : > { %v3019_v44 = vld [vmem:[#allocation2 + $0x18] sm:$0xff]  ;;  %v686_v6 = vld [vmem:[%s3418_s10 + $0xaf8] sm:$0xff] }
 0x15e   : > { %2569 = vmatpush1.bf16.msra.mxu0 %v2568_v53  ;;  %v571_v53 = vld [vmem:[%s3418_s10 + $0x760] sm:$0xff]  ;;  %v694_v17 = vld [vmem:[%s3418_s10 + $0xb38] sm:$0xff] }
 0x15f   : > { %2761 = vmatpush1.bf16.msra.mxu1 %v2760_v54  ;;  %2571 = vmatprep.subr.bf16.mxu0 %v2570_v55  ;;  %v565_v54 = vld [vmem:[%s3418_s10 + $0x730] sm:$0xff]  ;;  %v2782_v55 = vpack.c.bf16 %v574_v48, %v566_v47  ;;  %v2592_v61 = vpack.c.bf16 %v571_v53, %v563_v52  ;;  %v2802_v53 = vpack.c.bf16 %v654_v46, %v646_v45  ;;  %v702_v18 = vld [vmem:[%s3418_s10 + $0xb78] sm:$0xff]  ;;  %v723_v46 = vld [vmem:[%s3418_s10 + $0xc20] sm:$0xff] }
 0x160   : > { %2763 = vmatprep.subr.bf16.mxu1 %v2762_v59  ;;  %v582_v59 = vld [vmem:[%s3418_s10 + $0x7b8] sm:$0xff]  ;;  %v2784_v62 = vpack.c.bf16 %v573_v56, %v565_v54  ;;  %v645_v52 = vld [vmem:[%s3418_s10 + $0x9b0] sm:$0xff]  ;;  %v668_v56 = vld [vmem:[%s3418_s10 + $0xa68] sm:$0xff] }
 0x161   : > { %v653_v54 = vld [vmem:[%s3418_s10 + $0x9f0] sm:$0xff]  ;;  %v710_v29 = vld [vmem:[%s3418_s10 + $0xbb8] sm:$0xff] }
 0x162   : > { %2573 = vmatpush1.bf16.msra.mxu0 %v2572_v1  ;;  %v587_v1 = vld [vmem:[%s3418_s10 + $0x7e0] sm:$0xff]  ;;  %v718_v30 = vld [vmem:[%s3418_s10 + $0xbf8] sm:$0xff] }
 0x163   : > { %2765 = vmatpush1.bf16.msra.mxu1 %v2764_v2  ;;  %2575 = vmatprep.subr.bf16.mxu0 %v2574_v3  ;;  %v581_v2 = vld [vmem:[%s3418_s10 + $0x7b0] sm:$0xff]  ;;  %v2786_v3 = vpack.c.bf16 %v590_v60, %v582_v59  ;;  %v2596_v9 = vpack.c.bf16 %v587_v1, %v579_v0  ;;  %v2804_v60 = vpack.c.bf16 %v653_v54, %v645_v52  ;;  %v748_v52 = vld [vmem:[%s3418_s10 + $0xce8] sm:$0xff]  ;;  %v750_v54 = vld [vmem:[%s3418_s10 + $0xcf8] sm:$0xff] }
 0x164   : > { %2767 = vmatprep.subr.bf16.mxu1 %v2766_v7  ;;  %v598_v7 = vld [vmem:[%s3418_s10 + $0x838] sm:$0xff]  ;;  %v2788_v10 = vpack.c.bf16 %v589_v4, %v581_v2  ;;  %v661_v0 = vld [vmem:[%s3418_s10 + $0xa30] sm:$0xff]  ;;  %v2806_v1 = vpack.c.bf16 %v670_v58, %v662_v57  ;;  %v684_v4 = vld [vmem:[%s3418_s10 + $0xae8] sm:$0xff] }
 0x165   : > { %v669_v2 = vld [vmem:[%s3418_s10 + $0xa70] sm:$0xff]  ;;  %v739_v58 = vld [vmem:[%s3418_s10 + $0xca0] sm:$0xff] }
 0x166   : > { %2577 = vmatpush1.bf16.msra.mxu0 %v2576_v13  ;;  %v603_v13 = vld [vmem:[%s3418_s10 + $0x860] sm:$0xff] }
 0x167   : > { %2769 = vmatpush1.bf16.msra.mxu1 %v2768_v14  ;;  %2579 = vmatprep.subr.bf16.mxu0 %v2578_v15  ;;  %v597_v14 = vld [vmem:[%s3418_s10 + $0x830] sm:$0xff]  ;;  %v2790_v15 = vpack.c.bf16 %v606_v8, %v598_v7  ;;  %v2600_v21 = vpack.c.bf16 %v603_v13, %v595_v12  ;;  %v2808_v8 = vpack.c.bf16 %v669_v2, %v661_v0  ;;  %v764_v0 = vld [vmem:[%s3418_s10 + $0xd68] sm:$0xff]  ;;  %v766_v2 = vld [vmem:[%s3418_s10 + $0xd78] sm:$0xff] }
 0x168   : > { %2771 = vmatprep.subr.bf16.mxu1 %v2770_v19  ;;  %v614_v19 = vld [vmem:[%s3418_s10 + $0x8b8] sm:$0xff]  ;;  %v2792_v22 = vpack.c.bf16 %v605_v16, %v597_v14  ;;  %v677_v12 = vld [vmem:[%s3418_s10 + $0xab0] sm:$0xff]  ;;  %v2810_v13 = vpack.c.bf16 %v686_v6, %v678_v5  ;;  %v700_v16 = vld [vmem:[%s3418_s10 + $0xb68] sm:$0xff] }
 0x169   : > { %v685_v14 = vld [vmem:[%s3418_s10 + $0xaf0] sm:$0xff]  ;;  %v755_v6 = vld [vmem:[%s3418_s10 + $0xd20] sm:$0xff] }
 0x16a   : > { %2581 = vmatpush1.bf16.msra.mxu0 %v2580_v25  ;;  %v619_v25 = vld [vmem:[%s3418_s10 + $0x8e0] sm:$0xff] }
 0x16b   : > { %2773 = vmatpush1.bf16.msra.mxu1 %v2772_v26  ;;  %2583 = vmatprep.subr.bf16.mxu0 %v2582_v27  ;;  %v613_v26 = vld [vmem:[%s3418_s10 + $0x8b0] sm:$0xff]  ;;  %v2794_v27 = vpack.c.bf16 %v622_v20, %v614_v19  ;;  %v2604_v34 = vpack.c.bf16 %v619_v25, %v611_v24  ;;  %v2812_v20 = vpack.c.bf16 %v685_v14, %v677_v12  ;;  %v780_v12 = vld [vmem:[%s3418_s10 + $0xde8] sm:$0xff]  ;;  %v782_v14 = vld [vmem:[%s3418_s10 + $0xdf8] sm:$0xff] }
 0x16c   : > { %2775 = vmatprep.subr.bf16.mxu1 %v2774_v31  ;;  %v3018_v31 = vld [vmem:[#allocation2] sm:$0xff]  ;;  %v2796_v35 = vpack.c.bf16 %v621_v28, %v613_v26  ;;  %v2814_v25 = vpack.c.bf16 %v702_v18, %v694_v17  ;;  %v716_v28 = vld [vmem:[%s3418_s10 + $0xbe8] sm:$0xff]  ;;  %v771_v18 = vld [vmem:[%s3418_s10 + $0xda0] sm:$0xff] }
 0x16d   : > { %v693_v24 = vld [vmem:[%s3418_s10 + $0xb30] sm:$0xff] }
 0x16e   : > { %2585 = vmatpush1.bf16.msra.mxu0 %v2584_v37  ;;  %v627_v37 = vld [vmem:[%s3418_s10 + $0x920] sm:$0xff]  ;;  %v701_v26 = vld [vmem:[%s3418_s10 + $0xb70] sm:$0xff] }
 0x16f   : > { %2777 = vmatpush1.bf16.msra.mxu1 %v2776_v38  ;;  %2587 = vmatprep.subr.bf16.mxu0 %v2586_v39  ;;  %v635_v38 = vld [vmem:[%s3418_s10 + $0x960] sm:$0xff]  ;;  %v629_v39 = vld [vmem:[%s3418_s10 + $0x930] sm:$0xff]  ;;  %v2816_v32 = vpack.c.bf16 %v701_v26, %v693_v24  ;;  %v796_v24 = vld [vmem:[%s3418_s10 + $0xe68] sm:$0xff] }
 0x170   : > { %2779 = vmatprep.subr.bf16.mxu1 %v2778_v43  ;;  %v652_v43 = vld [vmem:[%s3418_s10 + $0x9e8] sm:$0xff]  ;;  %v2608_v47 = vpack.c.bf16 %v635_v38, %v627_v37  ;;  %v2800_v48 = vpack.c.bf16 %v637_v41, %v629_v39  ;;  %v2818_v37 = vpack.c.bf16 %v718_v30, %v710_v29  ;;  %v717_v38 = vld [vmem:[%s3418_s10 + $0xbf0] sm:$0xff]  ;;  %v726_v41 = vld [vmem:[%s3418_s10 + $0xc38] sm:$0xff] }
 0x171   : > { %v724_v39 = vld [vmem:[%s3418_s10 + $0xc28] sm:$0xff]  ;;  %v798_v26 = vld [vmem:[%s3418_s10 + $0xe78] sm:$0xff]  ;;  %v787_v30 = vld [vmem:[%s3418_s10 + $0xe20] sm:$0xff] }
 0x172   : > { %2589 = vmatpush1.bf16.msra.mxu0 %v2588_v49  ;;  %v2610_v49 = vpack.c.bf16 %v652_v43, %v644_v42  ;;  %v734_v42 = vld [vmem:[%s3418_s10 + $0xc78] sm:$0xff] }
 0x173   : > { %2781 = vmatpush1.bf16.msra.mxu1 %v2780_v50  ;;  %2591 = vmatprep.subr.bf16.mxu0 %v2590_v51  ;;  %v643_v50 = vld [vmem:[%s3418_s10 + $0x9a0] sm:$0xff] }
 0x174   : > { %2783 = vmatprep.subr.bf16.mxu1 %v2782_v55  ;;  %v651_v51 = vld [vmem:[%s3418_s10 + $0x9e0] sm:$0xff]  ;;  %v660_v55 = vld [vmem:[%s3418_s10 + $0xa28] sm:$0xff] }
 0x175   : > { %v2612_v59 = vpack.c.bf16 %v651_v51, %v643_v50  ;;  %v733_v50 = vld [vmem:[%s3418_s10 + $0xc70] sm:$0xff]  ;;  %v740_v51 = vld [vmem:[%s3418_s10 + $0xca8] sm:$0xff] }
 0x176   : > { %2593 = vmatpush1.bf16.msra.mxu0 %v2592_v61  ;;  %v2614_v61 = vpack.c.bf16 %v668_v56, %v660_v55  ;;  %v2634_v57 = vpack.c.bf16 %v748_v52, %v740_v51 }
 0x177   : > { %2785 = vmatpush1.bf16.msra.mxu1 %v2784_v62  ;;  %2595 = vmatprep.subr.bf16.mxu0 %v2594_v63  ;;  %v659_v62 = vld [vmem:[%s3418_s10 + $0xa20] sm:$0xff] }
 0x178   : > { %2787 = vmatprep.subr.bf16.mxu1 %v2786_v3  ;;  %v667_v63 = vld [vmem:[%s3418_s10 + $0xa60] sm:$0xff]  ;;  %v676_v3 = vld [vmem:[%s3418_s10 + $0xaa8] sm:$0xff] }
 0x179   : > { %v2616_v7 = vpack.c.bf16 %v667_v63, %v659_v62  ;;  %v749_v62 = vld [vmem:[%s3418_s10 + $0xcf0] sm:$0xff]  ;;  %v756_v63 = vld [vmem:[%s3418_s10 + $0xd28] sm:$0xff] }
 0x17a   : > { %2597 = vmatpush1.bf16.msra.mxu0 %v2596_v9  ;;  %v2618_v9 = vpack.c.bf16 %v684_v4, %v676_v3  ;;  %v2638_v5 = vpack.c.bf16 %v764_v0, %v756_v63 }
 0x17b   : > { %2789 = vmatpush1.bf16.msra.mxu1 %v2788_v10  ;;  %2599 = vmatprep.subr.bf16.mxu0 %v2598_v11  ;;  %v675_v10 = vld [vmem:[%s3418_s10 + $0xaa0] sm:$0xff] }
 0x17c   : > { %2791 = vmatprep.subr.bf16.mxu1 %v2790_v15  ;;  %v683_v11 = vld [vmem:[%s3418_s10 + $0xae0] sm:$0xff]  ;;  %v692_v15 = vld [vmem:[%s3418_s10 + $0xb28] sm:$0xff] }
 0x17d   : > { %1594 = vmatmul.mubr.f32.vlgmr.msra.gmra.mrb[2].mxu0 %v3018_v31  ;;  %v2620_v19 = vpack.c.bf16 %v683_v11, %v675_v10  ;;  %v765_v10 = vld [vmem:[%s3418_s10 + $0xd70] sm:$0xff]  ;;  %v772_v11 = vld [vmem:[%s3418_s10 + $0xda8] sm:$0xff] }
 0x17e   : > { %2601 = vmatpush1.bf16.msra.mxu0 %v2600_v21  ;;  %1807 = vmatmul.mubr.f32.vlgmr.msra.gmra.mrb[2].mxu1 %v3018_v31  ;;  %v2622_v21 = vpack.c.bf16 %v700_v16, %v692_v15  ;;  %v2642_v17 = vpack.c.bf16 %v780_v12, %v772_v11 }
 0x17f   : > { %2793 = vmatpush1.bf16.msra.mxu1 %v2792_v22  ;;  %2603 = vmatprep.subr.bf16.mxu0 %v2602_v23  ;;  %v691_v22 = vld [vmem:[%s3418_s10 + $0xb20] sm:$0xff] }
 0x180   : > { %2795 = vmatprep.subr.bf16.mxu1 %v2794_v27  ;;  %1664 = vmatprep.mubr.f32.mxu0 %v3019_v44  ;;  %v699_v23 = vld [vmem:[%s3418_s10 + $0xb60] sm:$0xff]  ;;  %v708_v27 = vld [vmem:[%s3418_s10 + $0xba8] sm:$0xff] }
 0x181   : > { %1877 = vmatprep.mubr.f32.mxu1 %v3019_v44  ;;  %v2624_v31 = vpack.c.bf16 %v699_v23, %v691_v22  ;;  %v2626_v33 = vpack.c.bf16 %v716_v28, %v708_v27  ;;  %v781_v22 = vld [vmem:[%s3418_s10 + $0xdf0] sm:$0xff]  ;;  %v788_v23 = vld [vmem:[%s3418_s10 + $0xe28] sm:$0xff] }
 0x182   : > { %2605 = vmatpush1.bf16.msra.mxu0 %v2604_v34  ;;  %v707_v34 = vld [vmem:[%s3418_s10 + $0xba0] sm:$0xff]  ;;  %v2646_v29 = vpack.c.bf16 %v796_v24, %v788_v23 }
 0x183   : > { %2797 = vmatpush1.bf16.msra.mxu1 %v2796_v35  ;;  %2607 = vmatprep.subr.bf16.mxu0 %v2606_v36  ;;  %v715_v35 = vld [vmem:[%s3418_s10 + $0xbe0] sm:$0xff]  ;;  %v709_v36 = vld [vmem:[%s3418_s10 + $0xbb0] sm:$0xff] }
 0x184   : > { %2799 = vmatprep.subr.bf16.mxu1 %v2798_v40  ;;  %v732_v40 = vld [vmem:[%s3418_s10 + $0xc68] sm:$0xff]  ;;  %v2628_v43 = vpack.c.bf16 %v715_v35, %v707_v34  ;;  %v2820_v44 = vpack.c.bf16 %v717_v38, %v709_v36  ;;  %v797_v34 = vld [vmem:[%s3418_s10 + $0xe70] sm:$0xff]  ;;  %v814_v38 = vld [vmem:[%s3418_s10 + $0xef8] sm:$0xff] }
 0x185   : > { %v2630_v45 = vpack.c.bf16 %v732_v40, %v724_v39  ;;  %v804_v35 = vld [vmem:[%s3418_s10 + $0xea8] sm:$0xff] }
 0x186   : > { %2609 = vmatpush1.bf16.msra.mxu0 %v2608_v47  ;;  %v731_v47 = vld [vmem:[%s3418_s10 + $0xc60] sm:$0xff]  ;;  %v812_v36 = vld [vmem:[%s3418_s10 + $0xee8] sm:$0xff] }
 0x187   : > { %2801 = vmatpush1.bf16.msra.mxu1 %v2800_v48  ;;  %2611 = vmatprep.subr.bf16.mxu0 %v2610_v49  ;;  %v725_v48 = vld [vmem:[%s3418_s10 + $0xc30] sm:$0xff]  ;;  %v2822_v49 = vpack.c.bf16 %v734_v42, %v726_v41  ;;  %v2632_v55 = vpack.c.bf16 %v731_v47, %v723_v46  ;;  %v2650_v41 = vpack.c.bf16 %v812_v36, %v804_v35  ;;  %v803_v42 = vld [vmem:[%s3418_s10 + $0xea0] sm:$0xff]  ;;  %v820_v47 = vld [vmem:[%s3418_s10 + $0xf28] sm:$0xff] }
 0x188   : > { %2803 = vmatprep.subr.bf16.mxu1 %v2802_v53  ;;  %v742_v53 = vld [vmem:[%s3418_s10 + $0xcb8] sm:$0xff]  ;;  %v2824_v56 = vpack.c.bf16 %v733_v50, %v725_v48  ;;  %v813_v46 = vld [vmem:[%s3418_s10 + $0xef0] sm:$0xff]  ;;  %v828_v48 = vld [vmem:[%s3418_s10 + $0xf68] sm:$0xff] }
 0x189   : > { %v830_v50 = vld [vmem:[%s3418_s10 + $0xf78] sm:$0xff] }
 0x18a   : > { %2613 = vmatpush1.bf16.msra.mxu0 %v2612_v59  ;;  %v747_v59 = vld [vmem:[%s3418_s10 + $0xce0] sm:$0xff]  ;;  %v894_v35 = vld [vmem:[%s3418_s10 + $0x1178] sm:$0xff] }
 0x18b   : > { %2805 = vmatpush1.bf16.msra.mxu1 %v2804_v60  ;;  %2615 = vmatprep.subr.bf16.mxu0 %v2614_v61  ;;  %v741_v60 = vld [vmem:[%s3418_s10 + $0xcb0] sm:$0xff]  ;;  %v2826_v61 = vpack.c.bf16 %v750_v54, %v742_v53  ;;  %v2636_v3 = vpack.c.bf16 %v747_v59, %v739_v58  ;;  %v2654_v53 = vpack.c.bf16 %v828_v48, %v820_v47  ;;  %v819_v54 = vld [vmem:[%s3418_s10 + $0xf20] sm:$0xff]  ;;  %v836_v59 = vld [vmem:[%s3418_s10 + $0xfa8] sm:$0xff] }
 0x18c   : > { %2807 = vmatprep.subr.bf16.mxu1 %v2806_v1  ;;  %v758_v1 = vld [vmem:[%s3418_s10 + $0xd38] sm:$0xff]  ;;  %v2828_v4 = vpack.c.bf16 %v749_v62, %v741_v60  ;;  %v829_v58 = vld [vmem:[%s3418_s10 + $0xf70] sm:$0xff]  ;;  %v844_v60 = vld [vmem:[%s3418_s10 + $0xfe8] sm:$0xff] }
 0x18d   : > { %v846_v62 = vld [vmem:[%s3418_s10 + $0xff8] sm:$0xff] }
 0x18e   : > { %2617 = vmatpush1.bf16.msra.mxu0 %v2616_v7  ;;  %v763_v7 = vld [vmem:[%s3418_s10 + $0xd60] sm:$0xff]  ;;  %v902_v47 = vld [vmem:[%s3418_s10 + $0x11b8] sm:$0xff] }
 0x18f   : > { %2809 = vmatpush1.bf16.msra.mxu1 %v2808_v8  ;;  %2619 = vmatprep.subr.bf16.mxu0 %v2618_v9  ;;  %v757_v8 = vld [vmem:[%s3418_s10 + $0xd30] sm:$0xff]  ;;  %v2830_v9 = vpack.c.bf16 %v766_v2, %v758_v1  ;;  %v2640_v15 = vpack.c.bf16 %v763_v7, %v755_v6  ;;  %v2658_v1 = vpack.c.bf16 %v844_v60, %v836_v59  ;;  %v835_v2 = vld [vmem:[%s3418_s10 + $0xfa0] sm:$0xff]  ;;  %v852_v7 = vld [vmem:[%s3418_s10 + $0x1028] sm:$0xff] }
 0x190   : > { %2811 = vmatprep.subr.bf16.mxu1 %v2810_v13  ;;  %v774_v13 = vld [vmem:[%s3418_s10 + $0xdb8] sm:$0xff]  ;;  %v2832_v16 = vpack.c.bf16 %v765_v10, %v757_v8  ;;  %v845_v6 = vld [vmem:[%s3418_s10 + $0xff0] sm:$0xff]  ;;  %v860_v8 = vld [vmem:[%s3418_s10 + $0x1068] sm:$0xff] }
 0x191   : > { %v862_v10 = vld [vmem:[%s3418_s10 + $0x1078] sm:$0xff] }
 0x192   : > { %2621 = vmatpush1.bf16.msra.mxu0 %v2620_v19  ;;  %v779_v19 = vld [vmem:[%s3418_s10 + $0xde0] sm:$0xff]  ;;  %v910_v48 = vld [vmem:[%s3418_s10 + $0x11f8] sm:$0xff] }
 0x193   : > { %2813 = vmatpush1.bf16.msra.mxu1 %v2812_v20  ;;  %2623 = vmatprep.subr.bf16.mxu0 %v2622_v21  ;;  %v773_v20 = vld [vmem:[%s3418_s10 + $0xdb0] sm:$0xff]  ;;  %v2834_v21 = vpack.c.bf16 %v782_v14, %v774_v13  ;;  %v2644_v27 = vpack.c.bf16 %v779_v19, %v771_v18  ;;  %v2662_v13 = vpack.c.bf16 %v860_v8, %v852_v7  ;;  %v851_v14 = vld [vmem:[%s3418_s10 + $0x1020] sm:$0xff]  ;;  %v868_v19 = vld [vmem:[%s3418_s10 + $0x10a8] sm:$0xff] }
 0x194   : > { %2815 = vmatprep.subr.bf16.mxu1 %v2814_v25  ;;  %v790_v25 = vld [vmem:[%s3418_s10 + $0xe38] sm:$0xff]  ;;  %v2836_v28 = vpack.c.bf16 %v781_v22, %v773_v20  ;;  %v861_v18 = vld [vmem:[%s3418_s10 + $0x1070] sm:$0xff]  ;;  %v876_v20 = vld [vmem:[%s3418_s10 + $0x10e8] sm:$0xff] }
 0x195   : > { %v878_v22 = vld [vmem:[%s3418_s10 + $0x10f8] sm:$0xff] }
 0x196   : > { %2625 = vmatpush1.bf16.msra.mxu0 %v2624_v31  ;;  %v795_v31 = vld [vmem:[%s3418_s10 + $0xe60] sm:$0xff]  ;;  %v918_v59 = vld [vmem:[%s3418_s10 + $0x1238] sm:$0xff] }
 0x197   : > { %2817 = vmatpush1.bf16.msra.mxu1 %v2816_v32  ;;  %2627 = vmatprep.subr.bf16.mxu0 %v2626_v33  ;;  %v789_v32 = vld [vmem:[%s3418_s10 + $0xe30] sm:$0xff]  ;;  %v2838_v33 = vpack.c.bf16 %v798_v26, %v790_v25  ;;  %v2648_v39 = vpack.c.bf16 %v795_v31, %v787_v30  ;;  %v2666_v25 = vpack.c.bf16 %v876_v20, %v868_v19  ;;  %v867_v26 = vld [vmem:[%s3418_s10 + $0x10a0] sm:$0xff]  ;;  %v884_v31 = vld [vmem:[%s3418_s10 + $0x1128] sm:$0xff] }
 0x198   : > { %2819 = vmatprep.subr.bf16.mxu1 %v2818_v37  ;;  %v806_v37 = vld [vmem:[%s3418_s10 + $0xeb8] sm:$0xff]  ;;  %v2840_v40 = vpack.c.bf16 %v797_v34, %v789_v32  ;;  %v877_v30 = vld [vmem:[%s3418_s10 + $0x10f0] sm:$0xff]  ;;  %v892_v32 = vld [vmem:[%s3418_s10 + $0x1168] sm:$0xff] }
 0x199   : > { %v886_v34 = vld [vmem:[%s3418_s10 + $0x1138] sm:$0xff] }
 0x19a   : > { %2629 = vmatpush1.bf16.msra.mxu0 %v2628_v43  ;;  %v811_v43 = vld [vmem:[%s3418_s10 + $0xee0] sm:$0xff]  ;;  %v926_v60 = vld [vmem:[%s3418_s10 + $0x1278] sm:$0xff] }
 0x19b   : > { %2821 = vmatpush1.bf16.msra.mxu1 %v2820_v44  ;;  %2631 = vmatprep.subr.bf16.mxu0 %v2630_v45  ;;  %v805_v44 = vld [vmem:[%s3418_s10 + $0xeb0] sm:$0xff]  ;;  %v2842_v45 = vpack.c.bf16 %v814_v38, %v806_v37  ;;  %v2652_v51 = vpack.c.bf16 %v811_v43, %v803_v42  ;;  %v2670_v38 = vpack.c.bf16 %v892_v32, %v884_v31  ;;  %v934_v7 = vld [vmem:[%s3418_s10 + $0x12b8] sm:$0xff] }
 0x19c   : > { %2823 = vmatprep.subr.bf16.mxu1 %v2822_v49  ;;  %v822_v49 = vld [vmem:[%s3418_s10 + $0xf38] sm:$0xff]  ;;  %v2844_v52 = vpack.c.bf16 %v813_v46, %v805_v44  ;;  %v2862_v42 = vpack.c.bf16 %v894_v35, %v886_v34  ;;  %v893_v43 = vld [vmem:[%s3418_s10 + $0x1170] sm:$0xff]  ;;  %v900_v44 = vld [vmem:[%s3418_s10 + $0x11a8] sm:$0xff] }
 0x19d   : > { %v3021_v46 = vld [vmem:[#allocation2 + $0x28] sm:$0xff] }
 0x19e   : > { %2633 = vmatpush1.bf16.msra.mxu0 %v2632_v55  ;;  %v827_v55 = vld [vmem:[%s3418_s10 + $0xf60] sm:$0xff]  ;;  %v942_v8 = vld [vmem:[%s3418_s10 + $0x12f8] sm:$0xff] }
 0x19f   : > { %2825 = vmatpush1.bf16.msra.mxu1 %v2824_v56  ;;  %2635 = vmatprep.subr.bf16.mxu0 %v2634_v57  ;;  %v821_v56 = vld [vmem:[%s3418_s10 + $0xf30] sm:$0xff]  ;;  %v2846_v57 = vpack.c.bf16 %v830_v50, %v822_v49  ;;  %v2656_v63 = vpack.c.bf16 %v827_v55, %v819_v54  ;;  %v2866_v55 = vpack.c.bf16 %v910_v48, %v902_v47  ;;  %v950_v19 = vld [vmem:[%s3418_s10 + $0x1338] sm:$0xff]  ;;  %v979_v48 = vld [vmem:[%s3418_s10 + $0x1420] sm:$0xff] }
 0x1a0   : > { %2827 = vmatprep.subr.bf16.mxu1 %v2826_v61  ;;  %v838_v61 = vld [vmem:[%s3418_s10 + $0xfb8] sm:$0xff]  ;;  %v2848_v0 = vpack.c.bf16 %v829_v58, %v821_v56  ;;  %v901_v54 = vld [vmem:[%s3418_s10 + $0x11b0] sm:$0xff]  ;;  %v924_v58 = vld [vmem:[%s3418_s10 + $0x1268] sm:$0xff] }
 0x1a1   : > { %v909_v56 = vld [vmem:[%s3418_s10 + $0x11f0] sm:$0xff]  ;;  %v958_v20 = vld [vmem:[%s3418_s10 + $0x1378] sm:$0xff] }
 0x1a2   : > { %2637 = vmatpush1.bf16.msra.mxu0 %v2636_v3  ;;  %v843_v3 = vld [vmem:[%s3418_s10 + $0xfe0] sm:$0xff]  ;;  %v966_v31 = vld [vmem:[%s3418_s10 + $0x13b8] sm:$0xff] }
 0x1a3   : > { %2829 = vmatpush1.bf16.msra.mxu1 %v2828_v4  ;;  %2639 = vmatprep.subr.bf16.mxu0 %v2638_v5  ;;  %v837_v4 = vld [vmem:[%s3418_s10 + $0xfb0] sm:$0xff]  ;;  %v2850_v5 = vpack.c.bf16 %v846_v62, %v838_v61  ;;  %v2660_v11 = vpack.c.bf16 %v843_v3, %v835_v2  ;;  %v2868_v62 = vpack.c.bf16 %v909_v56, %v901_v54  ;;  %v974_v32 = vld [vmem:[%s3418_s10 + $0x13f8] sm:$0xff]  ;;  %v1004_v54 = vld [vmem:[%s3418_s10 + $0x14e8] sm:$0xff] }
 0x1a4   : > { %2831 = vmatprep.subr.bf16.mxu1 %v2830_v9  ;;  %v854_v9 = vld [vmem:[%s3418_s10 + $0x1038] sm:$0xff]  ;;  %v2852_v12 = vpack.c.bf16 %v845_v6, %v837_v4  ;;  %v917_v2 = vld [vmem:[%s3418_s10 + $0x1230] sm:$0xff]  ;;  %v2870_v3 = vpack.c.bf16 %v926_v60, %v918_v59  ;;  %v940_v6 = vld [vmem:[%s3418_s10 + $0x12e8] sm:$0xff] }
 0x1a5   : > { %v925_v4 = vld [vmem:[%s3418_s10 + $0x1270] sm:$0xff]  ;;  %v1006_v56 = vld [vmem:[%s3418_s10 + $0x14f8] sm:$0xff]  ;;  %v995_v60 = vld [vmem:[%s3418_s10 + $0x14a0] sm:$0xff] }
 0x1a6   : > { %2641 = vmatpush1.bf16.msra.mxu0 %v2640_v15  ;;  %v859_v15 = vld [vmem:[%s3418_s10 + $0x1060] sm:$0xff] }
 0x1a7   : > { %2833 = vmatpush1.bf16.msra.mxu1 %v2832_v16  ;;  %2643 = vmatprep.subr.bf16.mxu0 %v2642_v17  ;;  %v853_v16 = vld [vmem:[%s3418_s10 + $0x1030] sm:$0xff]  ;;  %v2854_v17 = vpack.c.bf16 %v862_v10, %v854_v9  ;;  %v2664_v23 = vpack.c.bf16 %v859_v15, %v851_v14  ;;  %v2872_v10 = vpack.c.bf16 %v925_v4, %v917_v2  ;;  %v1020_v2 = vld [vmem:[%s3418_s10 + $0x1568] sm:$0xff]  ;;  %v1022_v4 = vld [vmem:[%s3418_s10 + $0x1578] sm:$0xff] }
 0x1a8   : > { %2835 = vmatprep.subr.bf16.mxu1 %v2834_v21  ;;  %v870_v21 = vld [vmem:[%s3418_s10 + $0x10b8] sm:$0xff]  ;;  %v2856_v24 = vpack.c.bf16 %v861_v18, %v853_v16  ;;  %v933_v14 = vld [vmem:[%s3418_s10 + $0x12b0] sm:$0xff]  ;;  %v2874_v15 = vpack.c.bf16 %v942_v8, %v934_v7  ;;  %v956_v18 = vld [vmem:[%s3418_s10 + $0x1368] sm:$0xff] }
 0x1a9   : > { %v941_v16 = vld [vmem:[%s3418_s10 + $0x12f0] sm:$0xff]  ;;  %v1011_v8 = vld [vmem:[%s3418_s10 + $0x1520] sm:$0xff] }
 0x1aa   : > { %2645 = vmatpush1.bf16.msra.mxu0 %v2644_v27  ;;  %v875_v27 = vld [vmem:[%s3418_s10 + $0x10e0] sm:$0xff] }
 0x1ab   : > { %2837 = vmatpush1.bf16.msra.mxu1 %v2836_v28  ;;  %2647 = vmatprep.subr.bf16.mxu0 %v2646_v29  ;;  %v869_v28 = vld [vmem:[%s3418_s10 + $0x10b0] sm:$0xff]  ;;  %v2858_v29 = vpack.c.bf16 %v878_v22, %v870_v21  ;;  %v2668_v36 = vpack.c.bf16 %v875_v27, %v867_v26  ;;  %v2876_v22 = vpack.c.bf16 %v941_v16, %v933_v14  ;;  %v1036_v14 = vld [vmem:[%s3418_s10 + $0x15e8] sm:$0xff]  ;;  %v1038_v16 = vld [vmem:[%s3418_s10 + $0x15f8] sm:$0xff] }
 0x1ac   : > { %2839 = vmatprep.subr.bf16.mxu1 %v2838_v33  ;;  %v3020_v33 = vld [vmem:[#allocation2 + $0x10] sm:$0xff]  ;;  %v2860_v37 = vpack.c.bf16 %v877_v30, %v869_v28  ;;  %v949_v26 = vld [vmem:[%s3418_s10 + $0x1330] sm:$0xff]  ;;  %v2878_v27 = vpack.c.bf16 %v958_v20, %v950_v19  ;;  %v972_v30 = vld [vmem:[%s3418_s10 + $0x13e8] sm:$0xff] }
 0x1ad   : > { %v957_v28 = vld [vmem:[%s3418_s10 + $0x1370] sm:$0xff]  ;;  %v1027_v20 = vld [vmem:[%s3418_s10 + $0x15a0] sm:$0xff] }
 0x1ae   : > { %2649 = vmatpush1.bf16.msra.mxu0 %v2648_v39  ;;  %v883_v39 = vld [vmem:[%s3418_s10 + $0x1120] sm:$0xff]  ;;  %v2880_v34 = vpack.c.bf16 %v957_v28, %v949_v26  ;;  %v1052_v26 = vld [vmem:[%s3418_s10 + $0x1668] sm:$0xff]  ;;  %v1054_v28 = vld [vmem:[%s3418_s10 + $0x1678] sm:$0xff] }
 0x1af   : > { %2841 = vmatpush1.bf16.msra.mxu1 %v2840_v40  ;;  %2651 = vmatprep.subr.bf16.mxu0 %v2650_v41  ;;  %v891_v40 = vld [vmem:[%s3418_s10 + $0x1160] sm:$0xff]  ;;  %v885_v41 = vld [vmem:[%s3418_s10 + $0x1130] sm:$0xff] }
 0x1b0   : > { %2843 = vmatprep.subr.bf16.mxu1 %v2842_v45  ;;  %v908_v45 = vld [vmem:[%s3418_s10 + $0x11e8] sm:$0xff]  ;;  %v2672_v49 = vpack.c.bf16 %v891_v40, %v883_v39  ;;  %v2864_v50 = vpack.c.bf16 %v893_v43, %v885_v41  ;;  %v2882_v39 = vpack.c.bf16 %v974_v32, %v966_v31  ;;  %v973_v40 = vld [vmem:[%s3418_s10 + $0x13f0] sm:$0xff]  ;;  %v982_v43 = vld [vmem:[%s3418_s10 + $0x1438] sm:$0xff] }
 0x1b1   : > { %v980_v41 = vld [vmem:[%s3418_s10 + $0x1428] sm:$0xff]  ;;  %v1043_v32 = vld [vmem:[%s3418_s10 + $0x1620] sm:$0xff] }
 0x1b2   : > { %2653 = vmatpush1.bf16.msra.mxu0 %v2652_v51  ;;  %v2674_v51 = vpack.c.bf16 %v908_v45, %v900_v44  ;;  %v990_v44 = vld [vmem:[%s3418_s10 + $0x1478] sm:$0xff] }
 0x1b3   : > { %2845 = vmatpush1.bf16.msra.mxu1 %v2844_v52  ;;  %2655 = vmatprep.subr.bf16.mxu0 %v2654_v53  ;;  %v899_v52 = vld [vmem:[%s3418_s10 + $0x11a0] sm:$0xff] }
 0x1b4   : > { %2847 = vmatprep.subr.bf16.mxu1 %v2846_v57  ;;  %v907_v53 = vld [vmem:[%s3418_s10 + $0x11e0] sm:$0xff]  ;;  %v916_v57 = vld [vmem:[%s3418_s10 + $0x1228] sm:$0xff] }
 0x1b5   : > { %v2676_v61 = vpack.c.bf16 %v907_v53, %v899_v52  ;;  %v989_v52 = vld [vmem:[%s3418_s10 + $0x1470] sm:$0xff]  ;;  %v996_v53 = vld [vmem:[%s3418_s10 + $0x14a8] sm:$0xff] }
 0x1b6   : > { %2657 = vmatpush1.bf16.msra.mxu0 %v2656_v63  ;;  %v2678_v63 = vpack.c.bf16 %v924_v58, %v916_v57  ;;  %v2698_v59 = vpack.c.bf16 %v1004_v54, %v996_v53 }
 0x1b7   : > { %2849 = vmatpush1.bf16.msra.mxu1 %v2848_v0  ;;  %2659 = vmatprep.subr.bf16.mxu0 %v2658_v1  ;;  %v915_v0 = vld [vmem:[%s3418_s10 + $0x1220] sm:$0xff] }
 0x1b8   : > { %2851 = vmatprep.subr.bf16.mxu1 %v2850_v5  ;;  %v923_v1 = vld [vmem:[%s3418_s10 + $0x1260] sm:$0xff]  ;;  %v932_v5 = vld [vmem:[%s3418_s10 + $0x12a8] sm:$0xff] }
 0x1b9   : > { %v2680_v9 = vpack.c.bf16 %v923_v1, %v915_v0  ;;  %v1005_v0 = vld [vmem:[%s3418_s10 + $0x14f0] sm:$0xff]  ;;  %v1012_v1 = vld [vmem:[%s3418_s10 + $0x1528] sm:$0xff] }
 0x1ba   : > { %2661 = vmatpush1.bf16.msra.mxu0 %v2660_v11  ;;  %v2682_v11 = vpack.c.bf16 %v940_v6, %v932_v5  ;;  %v2702_v7 = vpack.c.bf16 %v1020_v2, %v1012_v1 }
 0x1bb   : > { %2853 = vmatpush1.bf16.msra.mxu1 %v2852_v12  ;;  %2663 = vmatprep.subr.bf16.mxu0 %v2662_v13  ;;  %v931_v12 = vld [vmem:[%s3418_s10 + $0x12a0] sm:$0xff] }
 0x1bc   : > { %2855 = vmatprep.subr.bf16.mxu1 %v2854_v17  ;;  %v939_v13 = vld [vmem:[%s3418_s10 + $0x12e0] sm:$0xff]  ;;  %v948_v17 = vld [vmem:[%s3418_s10 + $0x1328] sm:$0xff] }
 0x1bd   : > { %1665 = vmatmul.mubr.f32.vlgmr.msra.gmra.mrb[2].mxu0 %v3020_v33  ;;  %v2684_v21 = vpack.c.bf16 %v939_v13, %v931_v12  ;;  %v1021_v12 = vld [vmem:[%s3418_s10 + $0x1570] sm:$0xff]  ;;  %v1028_v13 = vld [vmem:[%s3418_s10 + $0x15a8] sm:$0xff] }
 0x1be   : > { %2665 = vmatpush1.bf16.msra.mxu0 %v2664_v23  ;;  %1878 = vmatmul.mubr.f32.vlgmr.msra.gmra.mrb[2].mxu1 %v3020_v33  ;;  %v2686_v23 = vpack.c.bf16 %v956_v18, %v948_v17  ;;  %v2706_v19 = vpack.c.bf16 %v1036_v14, %v1028_v13 }
 0x1bf   : > { %2857 = vmatpush1.bf16.msra.mxu1 %v2856_v24  ;;  %2667 = vmatprep.subr.bf16.mxu0 %v2666_v25  ;;  %v947_v24 = vld [vmem:[%s3418_s10 + $0x1320] sm:$0xff] }
 0x1c0   : > { %2859 = vmatprep.subr.bf16.mxu1 %v2858_v29  ;;  %1735 = vmatprep.mubr.f32.mxu0 %v3021_v46  ;;  %v955_v25 = vld [vmem:[%s3418_s10 + $0x1360] sm:$0xff]  ;;  %v964_v29 = vld [vmem:[%s3418_s10 + $0x13a8] sm:$0xff] }
 0x1c1   : > { %1948 = vmatprep.mubr.f32.mxu1 %v3021_v46  ;;  %v2688_v33 = vpack.c.bf16 %v955_v25, %v947_v24  ;;  %v2690_v35 = vpack.c.bf16 %v972_v30, %v964_v29  ;;  %v1037_v24 = vld [vmem:[%s3418_s10 + $0x15f0] sm:$0xff]  ;;  %v1044_v25 = vld [vmem:[%s3418_s10 + $0x1628] sm:$0xff] }
 0x1c2   : > { %2669 = vmatpush1.bf16.msra.mxu0 %v2668_v36  ;;  %v963_v36 = vld [vmem:[%s3418_s10 + $0x13a0] sm:$0xff]  ;;  %v2710_v31 = vpack.c.bf16 %v1052_v26, %v1044_v25 }
 0x1c3   : > { %2861 = vmatpush1.bf16.msra.mxu1 %v2860_v37  ;;  %2671 = vmatprep.subr.bf16.mxu0 %v2670_v38  ;;  %v971_v37 = vld [vmem:[%s3418_s10 + $0x13e0] sm:$0xff]  ;;  %v965_v38 = vld [vmem:[%s3418_s10 + $0x13b0] sm:$0xff] }
 0x1c4   : > { %2863 = vmatprep.subr.bf16.mxu1 %v2862_v42  ;;  %v988_v42 = vld [vmem:[%s3418_s10 + $0x1468] sm:$0xff]  ;;  %v2692_v45 = vpack.c.bf16 %v971_v37, %v963_v36  ;;  %v2884_v46 = vpack.c.bf16 %v973_v40, %v965_v38  ;;  %v1053_v36 = vld [vmem:[%s3418_s10 + $0x1670] sm:$0xff]  ;;  %v1070_v40 = vld [vmem:[%s3418_s10 + $0x16f8] sm:$0xff] }
 0x1c5   : > { %v2694_v47 = vpack.c.bf16 %v988_v42, %v980_v41  ;;  %v1060_v37 = vld [vmem:[%s3418_s10 + $0x16a8] sm:$0xff] }
 0x1c6   : > { %2673 = vmatpush1.bf16.msra.mxu0 %v2672_v49  ;;  %v987_v49 = vld [vmem:[%s3418_s10 + $0x1460] sm:$0xff]  ;;  %v1068_v38 = vld [vmem:[%s3418_s10 + $0x16e8] sm:$0xff] }
 0x1c7   : > { %2865 = vmatpush1.bf16.msra.mxu1 %v2864_v50  ;;  %2675 = vmatprep.subr.bf16.mxu0 %v2674_v51  ;;  %v981_v50 = vld [vmem:[%s3418_s10 + $0x1430] sm:$0xff]  ;;  %v2886_v51 = vpack.c.bf16 %v990_v44, %v982_v43  ;;  %v2696_v57 = vpack.c.bf16 %v987_v49, %v979_v48  ;;  %v2714_v43 = vpack.c.bf16 %v1068_v38, %v1060_v37  ;;  %v1059_v44 = vld [vmem:[%s3418_s10 + $0x16a0] sm:$0xff]  ;;  %v1076_v49 = vld [vmem:[%s3418_s10 + $0x1728] sm:$0xff] }
 0x1c8   : > { %2867 = vmatprep.subr.bf16.mxu1 %v2866_v55  ;;  %v998_v55 = vld [vmem:[%s3418_s10 + $0x14b8] sm:$0xff]  ;;  %v2888_v58 = vpack.c.bf16 %v989_v52, %v981_v50  ;;  %v1069_v48 = vld [vmem:[%s3418_s10 + $0x16f0] sm:$0xff]  ;;  %v1084_v50 = vld [vmem:[%s3418_s10 + $0x1768] sm:$0xff] }
 0x1c9   : > { %v1086_v52 = vld [vmem:[%s3418_s10 + $0x1778] sm:$0xff] }
 0x1ca   : > { %2677 = vmatpush1.bf16.msra.mxu0 %v2676_v61  ;;  %v1003_v61 = vld [vmem:[%s3418_s10 + $0x14e0] sm:$0xff] }
 0x1cb   : > { %2869 = vmatpush1.bf16.msra.mxu1 %v2868_v62  ;;  %2679 = vmatprep.subr.bf16.mxu0 %v2678_v63  ;;  %v997_v62 = vld [vmem:[%s3418_s10 + $0x14b0] sm:$0xff]  ;;  %v2890_v63 = vpack.c.bf16 %v1006_v56, %v998_v55  ;;  %v2700_v5 = vpack.c.bf16 %v1003_v61, %v995_v60  ;;  %v2718_v55 = vpack.c.bf16 %v1084_v50, %v1076_v49  ;;  %v1075_v56 = vld [vmem:[%s3418_s10 + $0x1720] sm:$0xff]  ;;  %v1092_v61 = vld [vmem:[%s3418_s10 + $0x17a8] sm:$0xff] }
 0x1cc   : > { %2871 = vmatprep.subr.bf16.mxu1 %v2870_v3  ;;  %v1014_v3 = vld [vmem:[%s3418_s10 + $0x1538] sm:$0xff]  ;;  %v2892_v6 = vpack.c.bf16 %v1005_v0, %v997_v62  ;;  %v1085_v60 = vld [vmem:[%s3418_s10 + $0x1770] sm:$0xff]  ;;  %v1100_v62 = vld [vmem:[%s3418_s10 + $0x17e8] sm:$0xff] }
 0x1cd   : > { %v1102_v0 = vld [vmem:[%s3418_s10 + $0x17f8] sm:$0xff] }
 0x1ce   : > { %2681 = vmatpush1.bf16.msra.mxu0 %v2680_v9  ;;  %v1019_v9 = vld [vmem:[%s3418_s10 + $0x1560] sm:$0xff] }
 0x1cf   : > { %2873 = vmatpush1.bf16.msra.mxu1 %v2872_v10  ;;  %2683 = vmatprep.subr.bf16.mxu0 %v2682_v11  ;;  %v1013_v10 = vld [vmem:[%s3418_s10 + $0x1530] sm:$0xff]  ;;  %v2894_v11 = vpack.c.bf16 %v1022_v4, %v1014_v3  ;;  %v2704_v17 = vpack.c.bf16 %v1019_v9, %v1011_v8  ;;  %v2722_v3 = vpack.c.bf16 %v1100_v62, %v1092_v61  ;;  %v1091_v4 = vld [vmem:[%s3418_s10 + $0x17a0] sm:$0xff] }
 0x1d0   : > { %2875 = vmatprep.subr.bf16.mxu1 %v2874_v15  ;;  %v1030_v15 = vld [vmem:[%s3418_s10 + $0x15b8] sm:$0xff]  ;;  %v2896_v18 = vpack.c.bf16 %v1021_v12, %v1013_v10  ;;  %v1101_v8 = vld [vmem:[%s3418_s10 + $0x17f0] sm:$0xff]  ;;  %v273_v12 = vlaneseq }
 0x1d2   : > { %2685 = vmatpush1.bf16.msra.mxu0 %v2684_v21  ;;  %v1035_v21 = vld [vmem:[%s3418_s10 + $0x15e0] sm:$0xff]  ;;  %v274_v13 = vshrl.u32 %v273_v12, 7 }
 0x1d3   : > { %2877 = vmatpush1.bf16.msra.mxu1 %v2876_v22  ;;  %2687 = vmatprep.subr.bf16.mxu0 %v2686_v23  ;;  %v1029_v22 = vld [vmem:[%s3418_s10 + $0x15b0] sm:$0xff]  ;;  %v2898_v23 = vpack.c.bf16 %v1038_v16, %v1030_v15  ;;  %v2708_v29 = vpack.c.bf16 %v1035_v21, %v1027_v20  ;;  %v271_v15 = vld [vmem:[%s234_s7] sm:$0xff] }
 0x1d4   : > { %2879 = vmatprep.subr.bf16.mxu1 %v2878_v27  ;;  %v1046_v27 = vld [vmem:[%s3418_s10 + $0x1638] sm:$0xff]  ;;  %v2900_v30 = vpack.c.bf16 %v1037_v24, %v1029_v22  ;;  %v275_v14 = vsub.s32 0, %v274_v13  ;;  %v283_v16 = vsub.s32 2, %v274_v13  ;;  %v295_v37 = vsub.s32 5, %v274_v13 }
 0x1d5   : > { %v303_v38 = vsub.s32 7, %v274_v13 }
 0x1d6   : > { %2689 = vmatpush1.bf16.msra.mxu0 %v2688_v33  ;;  %v1051_v33 = vld [vmem:[%s3418_s10 + $0x1660] sm:$0xff]  ;;  %v284_v20 = vrot.slane %v271_v15, %v283_v16 }
 0x1d7   : > { %2881 = vmatpush1.bf16.msra.mxu1 %v2880_v34  ;;  %2691 = vmatprep.subr.bf16.mxu0 %v2690_v35  ;;  %v1045_v34 = vld [vmem:[%s3418_s10 + $0x1630] sm:$0xff]  ;;  %v2902_v35 = vpack.c.bf16 %v1054_v28, %v1046_v27  ;;  %v2712_v41 = vpack.c.bf16 %v1051_v33, %v1043_v32 }
 0x1d8   : > { %2883 = vmatprep.subr.bf16.mxu1 %v2882_v39  ;;  %v1062_v39 = vld [vmem:[%s3418_s10 + $0x16b8] sm:$0xff]  ;;  %v2904_v42 = vpack.c.bf16 %v1053_v36, %v1045_v34  ;;  %v299_v36 = vsub.s32 6, %v274_v13 }
 0x1da   : > { %2693 = vmatpush1.bf16.msra.mxu0 %v2692_v45  ;;  %v1067_v45 = vld [vmem:[%s3418_s10 + $0x16e0] sm:$0xff] }
 0x1db   : > { %2885 = vmatpush1.bf16.msra.mxu1 %v2884_v46  ;;  %2695 = vmatprep.subr.bf16.mxu0 %v2694_v47  ;;  %v1061_v46 = vld [vmem:[%s3418_s10 + $0x16b0] sm:$0xff]  ;;  %v2906_v47 = vpack.c.bf16 %v1070_v40, %v1062_v39  ;;  %v2716_v53 = vpack.c.bf16 %v1067_v45, %v1059_v44  ;;  %v300_v40 = vrot.slane %v271_v15, %v299_v36 }
 0x1dc   : > { %2887 = vmatprep.subr.bf16.mxu1 %v2886_v51  ;;  %v1078_v51 = vld [vmem:[%s3418_s10 + $0x1738] sm:$0xff]  ;;  %v2908_v54 = vpack.c.bf16 %v1069_v48, %v1061_v46 }
 0x1de   : > { %2697 = vmatpush1.bf16.msra.mxu0 %v2696_v57  ;;  %v1083_v57 = vld [vmem:[%s3418_s10 + $0x1760] sm:$0xff] }
 0x1df   : > { %2889 = vmatpush1.bf16.msra.mxu1 %v2888_v58  ;;  %2699 = vmatprep.subr.bf16.mxu0 %v2698_v59  ;;  %v1077_v58 = vld [vmem:[%s3418_s10 + $0x1730] sm:$0xff]  ;;  %v2910_v59 = vpack.c.bf16 %v1086_v52, %v1078_v51  ;;  %v2720_v1 = vpack.c.bf16 %v1083_v57, %v1075_v56 }
 0x1e0   : > { %2891 = vmatprep.subr.bf16.mxu1 %v2890_v63  ;;  %v1094_v63 = vld [vmem:[%s3418_s10 + $0x17b8] sm:$0xff]  ;;  %v2912_v2 = vpack.c.bf16 %v1085_v60, %v1077_v58 }
 0x1e2   : > { %2701 = vmatpush1.bf16.msra.mxu0 %v2700_v5  ;;  %v1099_v5 = vld [vmem:[%s3418_s10 + $0x17e0] sm:$0xff] }
 0x1e3   : > { %2893 = vmatpush1.bf16.msra.mxu1 %v2892_v6  ;;  %2703 = vmatprep.subr.bf16.mxu0 %v2702_v7  ;;  %v2914_v6 = vpack.c.bf16 %v1102_v0, %v1094_v63  ;;  %v1093_v7 = vld [vmem:[%s3418_s10 + $0x17b0] sm:$0xff]  ;;  %v2724_v9 = vpack.c.bf16 %v1099_v5, %v1091_v4 }
 0x1e4   : > { %2895 = vmatprep.subr.bf16.mxu1 %v2894_v11  ;;  %v2916_v10 = vpack.c.bf16 %v1101_v8, %v1093_v7  ;;  %v3022_v11 = vld [vmem:[#allocation2 + $0x20] sm:$0xff] }
 0x1e6   : > { %2705 = vmatpush1.bf16.msra.mxu0 %v2704_v17  ;;  %v279_v17 = vsub.s32 1, %v274_v13 }
 0x1e7   : > { %2897 = vmatpush1.bf16.msra.mxu1 %v2896_v18  ;;  %2707 = vmatprep.subr.bf16.mxu0 %v2706_v19  ;;  %v287_v18 = vsub.s32 3, %v274_v13  ;;  %v276_v19 = vrot.slane %v271_v15, %v275_v14 }
 0x1e8   : > { %2899 = vmatprep.subr.bf16.mxu1 %v2898_v23  ;;  %v280_v21 = vrot.slane %v271_v15, %v279_v17 }
 0x1e9   : > { %v288_v22 = vrot.slane %v271_v15, %v287_v18 }
 0x1ea   : > { %2709 = vmatpush1.bf16.msra.mxu0 %v2708_v29 }
 0x1eb   : > { %2901 = vmatpush1.bf16.msra.mxu1 %v2900_v30  ;;  %2711 = vmatprep.subr.bf16.mxu0 %v2710_v31 }
 0x1ec   : > { %2903 = vmatprep.subr.bf16.mxu1 %v2902_v35  ;;  %v291_v35 = vsub.s32 4, %v274_v13 }
 0x1ee   : > { %2713 = vmatpush1.bf16.msra.mxu0 %v2712_v41  ;;  %v292_v39 = vrot.slane %v271_v15, %v291_v35  ;;  %v296_v41 = vrot.slane %v271_v15, %v295_v37 }
 0x1ef   : > { %2905 = vmatpush1.bf16.msra.mxu1 %v2904_v42  ;;  %2715 = vmatprep.subr.bf16.mxu0 %v2714_v43  ;;  %v304_v42 = vrot.slane %v271_v15, %v303_v38 }
 0x1f0   : > { %2907 = vmatprep.subr.bf16.mxu1 %v2906_v47 }
 0x1f2   : > { %2717 = vmatpush1.bf16.msra.mxu0 %v2716_v53 }
 0x1f3   : > { %2909 = vmatpush1.bf16.msra.mxu1 %v2908_v54  ;;  %2719 = vmatprep.subr.bf16.mxu0 %v2718_v55 }
 0x1f4   : > { %2911 = vmatprep.subr.bf16.mxu1 %v2910_v59 }
 0x1f6   : > { %2721 = vmatpush1.bf16.msra.mxu0 %v2720_v1 }
 0x1f7   : > { %2913 = vmatpush1.bf16.msra.mxu1 %v2912_v2  ;;  %2723 = vmatprep.subr.bf16.mxu0 %v2722_v3 }
 0x1f8   : > { %2915 = vmatprep.subr.bf16.mxu1 %v2914_v6 }
 0x1fa   : > { %2725 = vmatpush1.bf16.msra.mxu0 %v2724_v9 }
 0x1fb   : > { %2917 = vmatpush1.bf16.msra.mxu1 %v2916_v10 }
 0x1fd   : > { %1736 = vmatmul.mubr.f32.vlgmr.msra.gmra.mrb[2].mxu0 %v3022_v11 }
 0x1fe   : > { %1949 = vmatmul.mubr.f32.vlgmr.msra.gmra.mrb[2].mxu1 %v3022_v11 }
 0x210   : > { %v1311_v23 = vpop.f32.mrb[0].mxu0 }
 0x211   : > { %v1955_v24 = vadd.f32 %v1311_v23, %v276_v19  ;;  %v1524_v25 = vpop.f32.mrb[0].mxu1  ;;  %v1313_v26 = vpop.f32.mrb[1].mxu0 }
 0x212   : > { %v1957_v27 = vadd.f32 %v1524_v25, %v284_v20  ;;  %v1956_v28 = vadd.f32 %v1313_v26, %v280_v21  ;;  %v1526_v29 = vpop.f32.mrb[1].mxu1 }
 0x213   : > { %v1982_v30 = vmax.f32 %v1955_v24, 0.0  ;;  %v1958_v31 = vadd.f32 %v1526_v29, %v288_v22 }
 0x214   : > { %v1984_v32 = vmax.f32 %v1957_v27, 0.0  ;;  %v1983_v33 = vmax.f32 %v1956_v28, 0.0 }
 0x215   : > { %1990 = vst [vmem:[%s4194_s11] sm:$0xff] %v1982_v30  ;;  %v1985_v34 = vmax.f32 %v1958_v31, 0.0 }
 0x216   : > { %1992 = vst [vmem:[%s4194_s11 + $0x10] sm:$0xff] %v1984_v32  ;;  %1991 = vst [vmem:[%s4194_s11 + $0x8] sm:$0xff] %v1983_v33 }
 0x217   : > { %1993 = vst [vmem:[%s4194_s11 + $0x18] sm:$0xff] %v1985_v34 }
 0x2d0   : > { %v1737_v43 = vpop.f32.mrb[2].mxu0 }
 0x2d1   : > { %v1959_v44 = vadd.f32 %v1737_v43, %v292_v39  ;;  %v1950_v45 = vpop.f32.mrb[2].mxu1  ;;  %v1739_v46 = vpop.f32.mrb[3].mxu0 }
 0x2d2   : > { %v1961_v47 = vadd.f32 %v1950_v45, %v300_v40  ;;  %v1960_v48 = vadd.f32 %v1739_v46, %v296_v41  ;;  %v1952_v49 = vpop.f32.mrb[3].mxu1 }
 0x2d3   : > { %v1986_v50 = vmax.f32 %v1959_v44, 0.0  ;;  %v1962_v51 = vadd.f32 %v1952_v49, %v304_v42 }
 0x2d4   : > { %v1988_v52 = vmax.f32 %v1961_v47, 0.0  ;;  %v1987_v53 = vmax.f32 %v1960_v48, 0.0 }
 0x2d5   : > { %1994 = vst [vmem:[%s4194_s11 + $0x20] sm:$0xff] %v1986_v50  ;;  %v1989_v54 = vmax.f32 %v1962_v51, 0.0 }
 0x2d6   : > { %1996 = vst [vmem:[%s4194_s11 + $0x30] sm:$0xff] %v1988_v52  ;;  %1995 = vst [vmem:[%s4194_s11 + $0x28] sm:$0xff] %v1987_v53 }
 0x2d7   : > { %1997 = vst [vmem:[%s4194_s11 + $0x38] sm:$0xff] %v1989_v54 }
 0x2d8   : > { %3124 = shalt.err (!%p3121_p2)
}
 0x2d9   : > { %s3125_s23 = scalar_lea.hbm %s4206_s8, 1024  ;;  %s3129_s6 = scalar_lea.hbm %s4261_s3, 2048 }
 0x2da   : > { %p3126_p6 = scmp.ne.s32.totalorder %s4206_s8, %s3125_s23  ;;  %p3130_p8 = scmp.lt.u32.totalorder %s4206_s8, %s4261_s3 }
 0x2db   : > { %p3131_p5 = scmp.lt.u32.totalorder %s3129_s6, %s3125_s23  ;;  %p3133_p10 = scmp.lt.u32.totalorder %s3125_s23, %s4206_s8 }
 0x2dc   : > { %p3127_p12 = pnand %p3126_p6, %p4280_p13 }
 0x2dd   : > { %p3132_p11 = por %p3131_p5, %p3130_p8 }
 0x2de   : > { %p3128_p9 = pneg %p3127_p12 }
 0x2df   : > { %p3134_p0 = por %p3133_p10, %p3132_p11 }
 0x2e1   : > { %p3135_p7 = pnand %p3134_p0, %p3128_p9 }
 0x2e3   : > { %3138 = shalt.err (!%p3135_p7)
}
 0x2e4   : > { %2944 = dma.vmem_to_hbm [thread:$0]  (%p4280_p13), %s4208_s19, 1024, %s4206_s8, %s1999_s15  }
 0x2e5 PF: > { %s2025_s7 = sand.u32 1, %s3177_s12   ;;  %p4281_p4 = scmp.ne.s32.totalorder %s4272_s4, 0 }
 0x2e6   : > { %p4282_p1 = scmp.ge.s32.totalorder %s3197_s17, 2  ;;  %s2026_s9 = scalar_lea.sflag [#allocation4], %s2025_s7 }
 0x2e8   : > { %p2958_p3 = pnand %p4282_p1, %p4281_p4 }
 0x2ea   : > { %3172 = dma.done.wait (!%p2958_p3), %s2026_s9, 1024  }
 0x2eb   : > { %3174 = vsyncadd (!%p2958_p3), %s2026_s9, 4294966272  ;;  %s20_s17 = sadd.s32 1, %s3197_s17   ;;  %s4283_s12 = smov %s3181_s13 }
 0x2ec   : > { %p17_p2 = scmp.ge.s32.totalorder %s20_s17, 4   ;;  %s4284_s13 = smov %s3185_s14 }
 0x2ed   : > { %s4285_s14 = smov %s3274_s24  ;;  %s4286_s15 = smov %s3193_s16 }
 0x2ee   : > { %s4287_s16 = smov %s4289_s18  ;;  %19 = sbr.rel (!%p17_p2) target bundleno = 9 (0x9), region = 102 }
 0x2f5   :  { %2031 = vsyncpa [#allocation3], 1 }
 0x2f6   :  { %2033 = vsyncpa [#allocation3 + $0x1], 1 }
 0x2f7   :  { %2034 = vsyncpa [#allocation6], 1 }
 0x2f8   :  { %2036 = vsyncpa [#allocation6 + $0x1], 1 }
 0x2f9   :  { %2037 = vsyncpa [#allocation4], 1 }
 0x2fa   :  { %2039 = vsyncpa [#allocation4 + $0x1], 1 }

</bundles_post_ra>
